<compile_context>
chip_gen: v5e
topology: v5e:2x2
jax: 0.10.0
libtpu: 0.0.40
codegen_flags: <defaults>
</compile_context>

<pallas_src>
import math

import jax
import jax.numpy as jnp
from jax.experimental import pallas as pl
from jax.experimental.pallas import tpu as pltpu


def _layernorm(x, gamma, beta, eps=1e-5):
    mean = jnp.mean(x, axis=-1, keepdims=True)
    var = jnp.mean((x - mean) ** 2, axis=-1, keepdims=True)
    return (x - mean) * jax.lax.rsqrt(var + eps) * gamma + beta


def _gelu_exact(x):
    # PyTorch nn.GELU() default (erf-based, exact)
    return 0.5 * x * (1.0 + jax.lax.erf(x * (1.0 / math.sqrt(2.0))))


def _make_kernel(*, S, H, D_out, BB):
    """Kernel closure over static sizes (S tokens, H heads, D_out per head,
    BB batch elements per grid step)."""
    HD = H * D_out
    inv_scale = 1.0 / math.sqrt(S)  # module quirk: query.size(1) == S

    def kernel(x_ref, mask_ref,
               wqkv_ref, bqkv_ref, wo_ref, bo_ref, g1_ref, be1_ref,
               w1_ref, b1_ref, w2_ref, b2_ref, g2_ref, be2_ref,
               o_ref, ctx_ref):
        x = x_ref[...]                                  # (BB*S, D_in)

        # --- fused Q|K|V projection for all heads & all tokens in the block ---
        qkv = jnp.dot(x, wqkv_ref[...],
                      preferred_element_type=jnp.float32) + bqkv_ref[...]

        for b in range(BB):                             # static unrolled
            r0 = b * S
            # hoist the mask compare out of the head loop (done once per batch)
            mask_b = mask_ref[b] != 0                   # (S, S) bool
            q_b = qkv[r0:r0 + S, 0:HD]
            k_b = qkv[r0:r0 + S, HD:2 * HD]
            v_b = qkv[r0:r0 + S, 2 * HD:3 * HD]
            for h in range(H):                          # static unrolled
                c0 = h * D_out
                q = q_b[:, c0:c0 + D_out]
                k = k_b[:, c0:c0 + D_out]
                v = v_b[:, c0:c0 + D_out]
                scores = jnp.dot(q, k.T,
                                 preferred_element_type=jnp.float32) * inv_scale
                # masked_fill semantics.  NOTE: a fully-masked row yields a
                # uniform distribution over the masked keys (all scores -1e9),
                # identical to the PyTorch module's behavior.
                scores = jnp.where(mask_b, jnp.float32(-1e9), scores)
                scores = scores - jnp.max(scores, axis=-1, keepdims=True)
                p = jnp.exp(scores)
                inv_l = pl.reciprocal(jnp.sum(p, axis=-1, keepdims=True))
                attn = p * inv_l
                # write this head's context straight into its lane slice of the
                # shared scratch -- no concatenate.
                ctx_ref[r0:r0 + S, c0:c0 + D_out] = jnp.dot(
                    attn, v, preferred_element_type=jnp.float32)

        ctx = ctx_ref[...]                              # (BB*S, H*D_out)

        # MultiHeadAttention output projection + LayerNorm
        a = jnp.dot(ctx, wo_ref[...],
                    preferred_element_type=jnp.float32) + bo_ref[...]
        h1 = _layernorm(a, g1_ref[...], be1_ref[...])

        # Feedforward (Dropout == identity in eval mode) + final LayerNorm
        f = jnp.dot(h1, w1_ref[...],
                    preferred_element_type=jnp.float32) + b1_ref[...]
        f = _gelu_exact(f)
        f = jnp.dot(f, w2_ref[...],
                    preferred_element_type=jnp.float32) + b2_ref[...]
        o_ref[...] = _layernorm(f, g2_ref[...], be2_ref[...])

    return kernel


def _num_batch_blocks(B):
    """v5e/v6e: one TensorCore -> one grid step for the whole batch.
    v7x-like chips: two TensorCores -> split the batch 2-way (parallel)."""
    try:
        kind = jax.devices()[0].device_kind.lower()
    except Exception:
        kind = ""
    if ("7" in kind) and (B % 2 == 0):
        return 2
    return 1


def encoder_forward(x, mask, params, batch_blocks=None):
    B, S, D_in = x.shape
    H, _, D_out = params["wq"].shape
    nb = _num_batch_blocks(B) if batch_blocks is None else batch_blocks
    assert B % nb == 0
    BB = B // nb

    # --- wrapper-side weight packing: one (D_in, 3*H*D_out) QKV weight ---
    w_qkv = jnp.concatenate(
        [params[k].transpose(1, 0, 2).reshape(D_in, H * D_out)
         for k in ("wq", "wk", "wv")], axis=-1)                 # (D_in, 3*H*D_out)
    b_qkv = jnp.concatenate(
        [params[k].reshape(1, H * D_out)
         for k in ("bq", "bk", "bv")], axis=-1)                 # (1, 3*H*D_out)

    weights = [w_qkv, b_qkv,
               params["wo"], params["bo"], params["g1"], params["be1"],
               params["w1"], params["b1"], params["w2"], params["b2"],
               params["g2"], params["be2"]]

    def rep_spec(a):
        nd = a.ndim
        return pl.BlockSpec(a.shape, lambda i, _nd=nd: (0,) * _nd)

    x2d = x.reshape(B * S, D_in)            # wrapper-side flatten (layout plumbing)
    mask_i32 = mask.astype(jnp.int32)

    in_specs = [
        pl.BlockSpec((BB * S, D_in), lambda i: (i, 0)),
        pl.BlockSpec((BB, S, S), lambda i: (i, 0, 0)),
    ] + [rep_spec(w) for w in weights]

    kernel = _make_kernel(S=S, H=H, D_out=D_out, BB=BB)

    out2d = pl.pallas_call(
        kernel,
        out_shape=jax.ShapeDtypeStruct((B * S, D_in), jnp.float32),
        grid_spec=pltpu.PrefetchScalarGridSpec(
            num_scalar_prefetch=0,
            grid=(nb,),
            in_specs=in_specs,
            out_specs=pl.BlockSpec((BB * S, D_in), lambda i: (i, 0)),
            scratch_shapes=[pltpu.VMEM((BB * S, H * D_out), jnp.float32)],
        ),
        compiler_params=pltpu.CompilerParams(
            dimension_semantics=("parallel",)),
    )(x2d, mask_i32, *weights)
    return out2d.reshape(B, S, D_in)


def encoder_reference(x, mask, p):
    """Pure-JAX reference mirroring the PyTorch module (eval mode)."""
    S = x.shape[1]
    scale = S ** 0.5
    ctxs = []
    for h in range(p["wq"].shape[0]):
        q = x @ p["wq"][h] + p["bq"][h]
        k = x @ p["wk"][h] + p["bk"][h]
        v = x @ p["wv"][h] + p["bv"][h]
        scores = jnp.einsum("bqd,bkd->bqk", q, k) / scale
        scores = jnp.where(mask != 0, -1e9, scores)
        attn = jax.nn.softmax(scores, axis=-1)
        ctxs.append(attn @ v)
    ctx = jnp.concatenate(ctxs, axis=-1)
    a = ctx @ p["wo"] + p["bo"]
    h1 = _layernorm(a, p["g1"], p["be1"])
    f = _gelu_exact(h1 @ p["w1"] + p["b1"])
    f = f @ p["w2"] + p["b2"]
    return _layernorm(f, p["g2"], p["be2"])


def make_params(key, num_heads, dim_inp, dim_out):
    """Deterministic synthetic parameters (Linear weights stored as (in, out))."""
    ks = jax.random.split(key, 10)
    s = 0.05
    params = {
        "wq": jax.random.normal(ks[0], (num_heads, dim_inp, dim_out), jnp.float32) * s,
        "bq": jax.random.normal(ks[1], (num_heads, 1, dim_out), jnp.float32) * s,
        "wk": jax.random.normal(ks[2], (num_heads, dim_inp, dim_out), jnp.float32) * s,
        "bk": jax.random.normal(ks[3], (num_heads, 1, dim_out), jnp.float32) * s,
        "wv": jax.random.normal(ks[4], (num_heads, dim_inp, dim_out), jnp.float32) * s,
        "bv": jax.random.normal(ks[5], (num_heads, 1, dim_out), jnp.float32) * s,
        "wo": jax.random.normal(ks[6], (num_heads * dim_out, dim_inp), jnp.float32) * s,
        "bo": jax.random.normal(ks[7], (1, dim_inp), jnp.float32) * s,
        "g1": jnp.ones((1, dim_inp), jnp.float32),
        "be1": jnp.zeros((1, dim_inp), jnp.float32),
        "w1": jax.random.normal(ks[8], (dim_inp, dim_out), jnp.float32) * s,
        "b1": jnp.zeros((1, dim_out), jnp.float32),
        "w2": jax.random.normal(ks[9], (dim_out, dim_inp), jnp.float32) * s,
        "b2": jnp.zeros((1, dim_inp), jnp.float32),
        "g2": jnp.ones((1, dim_inp), jnp.float32),
        "be2": jnp.zeros((1, dim_inp), jnp.float32),
    }
    return params


if __name__ == "__main__":
    # small shapes consistent with the module: batch=2, seq=8, dim_inp=32, dim_out=16
    B, S, D_IN, D_OUT, HEADS = 2, 8, 32, 16, 4

    key = jax.random.PRNGKey(0)
    kx, kp = jax.random.split(key)
    x = jax.random.normal(kx, (B, S, D_IN), jnp.float32)

    # padding-style boolean mask: key positions >= valid length are masked
    lens = jnp.array([S, 5], dtype=jnp.int32)
    key_pos = jnp.arange(S, dtype=jnp.int32)
    mask = (key_pos[None, None, :] >= lens[:, None, None])          # (B, 1, S)
    mask = jnp.broadcast_to(mask, (B, S, S)).astype(jnp.int32)       # (B, S, S)

    params = make_params(kp, HEADS, D_IN, D_OUT)

    # TODO(synk): Dropout(p=0.1) from the PyTorch module is treated as identity
    # (eval-mode semantics); no stochastic masking is performed in the kernel.
    out = encoder_forward(x, mask, params)
    out = jax.block_until_ready(out)

    ref = encoder_reference(x, mask, params)
    assert out.shape == (B, S, D_IN)
    assert jnp.allclose(out, ref, atol=1e-4, rtol=1e-4), "mismatch vs reference"
    print("KERNEL_OK")
</pallas_src>

<mosaic_0001>
module attributes {stable_mosaic.version = 11 : i64} {
  func.func @kernel(%arg0: i32, %arg1: memref<16x32xf32, #tpu.memory_space<vmem>>, %arg2: memref<2x8x8xi32, #tpu.memory_space<vmem>>, %arg3: memref<32x192xf32, #tpu.memory_space<vmem>>, %arg4: memref<1x192xf32, #tpu.memory_space<vmem>>, %arg5: memref<64x32xf32, #tpu.memory_space<vmem>>, %arg6: memref<1x32xf32, #tpu.memory_space<vmem>>, %arg7: memref<1x32xf32, #tpu.memory_space<vmem>>, %arg8: memref<1x32xf32, #tpu.memory_space<vmem>>, %arg9: memref<32x16xf32, #tpu.memory_space<vmem>>, %arg10: memref<1x16xf32, #tpu.memory_space<vmem>>, %arg11: memref<16x32xf32, #tpu.memory_space<vmem>>, %arg12: memref<1x32xf32, #tpu.memory_space<vmem>>, %arg13: memref<1x32xf32, #tpu.memory_space<vmem>>, %arg14: memref<1x32xf32, #tpu.memory_space<vmem>>, %arg15: memref<16x32xf32, #tpu.memory_space<vmem>>, %arg16: memref<16x64xf32, #tpu.memory_space<vmem>>) attributes {dimension_semantics = [#tpu.dimension_semantics<parallel>], iteration_bounds = array<i64: 1>, scalar_prefetch = 0 : i64, scratch_operands = 1 : i64, tpu.core_type = #tpu.core_type<tc>, window_params = [{transform_indices = @transform_0, window_bounds = array<i64: 16, 32>}, {transform_indices = @transform_1, window_bounds = array<i64: 2, 8, 8>}, {pipeline_mode = #tpu.pipeline_mode<synchronous>, transform_indices = @transform_2, window_bounds = array<i64: 32, 192>}, {pipeline_mode = #tpu.pipeline_mode<synchronous>, transform_indices = @transform_3, window_bounds = array<i64: 1, 192>}, {pipeline_mode = #tpu.pipeline_mode<synchronous>, transform_indices = @transform_4, window_bounds = array<i64: 64, 32>}, {pipeline_mode = #tpu.pipeline_mode<synchronous>, transform_indices = @transform_5, window_bounds = array<i64: 1, 32>}, {pipeline_mode = #tpu.pipeline_mode<synchronous>, transform_indices = @transform_6, window_bounds = array<i64: 1, 32>}, {pipeline_mode = #tpu.pipeline_mode<synchronous>, transform_indices = @transform_7, window_bounds = array<i64: 1, 32>}, {pipeline_mode = #tpu.pipeline_mode<synchronous>, transform_indices = @transform_8, window_bounds = array<i64: 32, 16>}, {pipeline_mode = #tpu.pipeline_mode<synchronous>, transform_indices = @transform_9, window_bounds = array<i64: 1, 16>}, {pipeline_mode = #tpu.pipeline_mode<synchronous>, transform_indices = @transform_10, window_bounds = array<i64: 16, 32>}, {pipeline_mode = #tpu.pipeline_mode<synchronous>, transform_indices = @transform_11, window_bounds = array<i64: 1, 32>}, {pipeline_mode = #tpu.pipeline_mode<synchronous>, transform_indices = @transform_12, window_bounds = array<i64: 1, 32>}, {pipeline_mode = #tpu.pipeline_mode<synchronous>, transform_indices = @transform_13, window_bounds = array<i64: 1, 32>}, {transform_indices = @transform_14, window_bounds = array<i64: 16, 32>}]} {
    %c0 = arith.constant 0 : index
    %c0_0 = arith.constant 0 : index
    %0 = vector.load %arg1[%c0, %c0_0] : memref<16x32xf32, #tpu.memory_space<vmem>>, vector<16x32xf32>
    %c0_1 = arith.constant 0 : index
    %c0_2 = arith.constant 0 : index
    %1 = vector.load %arg3[%c0_1, %c0_2] : memref<32x192xf32, #tpu.memory_space<vmem>>, vector<32x192xf32>
    %cst = arith.constant dense<0.000000e+00> : vector<16x192xf32>
    %2 = tpu.matmul %0, %1, %cst {dimension_numbers = #tpu.dot_dimension_numbers<[1], [0], [0], [1], [0, 0, 1, 1], [], []>} : vector<16x32xf32>, vector<32x192xf32>, vector<16x192xf32> -> vector<16x192xf32>
    %c0_3 = arith.constant 0 : index
    %c0_4 = arith.constant 0 : index
    %3 = vector.load %arg4[%c0_3, %c0_4] : memref<1x192xf32, #tpu.memory_space<vmem>>, vector<1x192xf32>
    %4 = vector.broadcast %3 : vector<1x192xf32> to vector<16x192xf32>
    %5 = arith.addf %2, %4 : vector<16x192xf32>
    %c0_5 = arith.constant 0 : index
    %c0_6 = arith.constant 0 : index
    %c0_7 = arith.constant 0 : index
    %6 = vector.load %arg2[%c0_5, %c0_6, %c0_7] : memref<2x8x8xi32, #tpu.memory_space<vmem>>, vector<1x8x8xi32>
    %7 = vector.shape_cast %6 : vector<1x8x8xi32> to vector<8x8xi32>
    %c0_i32 = arith.constant 0 : i32
    %8 = vector.broadcast %c0_i32 : i32 to vector<8x8xi32>
    %9 = arith.cmpi ne, %7, %8 : vector<8x8xi32>
    %10 = vector.extract_strided_slice %5 {offsets = [0, 0], sizes = [8, 64], strides = [1, 1]} : vector<16x192xf32> to vector<8x64xf32>
    %11 = vector.extract_strided_slice %5 {offsets = [0, 64], sizes = [8, 64], strides = [1, 1]} : vector<16x192xf32> to vector<8x64xf32>
    %12 = vector.extract_strided_slice %5 {offsets = [0, 128], sizes = [8, 64], strides = [1, 1]} : vector<16x192xf32> to vector<8x64xf32>
    %13 = vector.extract_strided_slice %10 {offsets = [0, 0], sizes = [8, 16], strides = [1, 1]} : vector<8x64xf32> to vector<8x16xf32>
    %14 = vector.extract_strided_slice %11 {offsets = [0, 0], sizes = [8, 16], strides = [1, 1]} : vector<8x64xf32> to vector<8x16xf32>
    %15 = vector.extract_strided_slice %12 {offsets = [0, 0], sizes = [8, 16], strides = [1, 1]} : vector<8x64xf32> to vector<8x16xf32>
    %16 = tpu.transpose %14, [1, 0] : vector<8x16xf32> -> vector<16x8xf32>
    %cst_8 = arith.constant dense<0.000000e+00> : vector<8x8xf32>
    %17 = tpu.matmul %13, %16, %cst_8 {dimension_numbers = #tpu.dot_dimension_numbers<[1], [0], [0], [1], [0, 0, 1, 1], [], []>} : vector<8x16xf32>, vector<16x8xf32>, vector<8x8xf32> -> vector<8x8xf32>
    %cst_9 = arith.constant 0.353553385 : f32
    %18 = vector.broadcast %cst_9 : f32 to vector<8x8xf32>
    %19 = arith.mulf %17, %18 : vector<8x8xf32>
    %cst_10 = arith.constant -1.000000e+09 : f32
    %20 = vector.broadcast %cst_10 : f32 to vector<8x8xf32>
    %21 = arith.select %9, %20, %19 : vector<8x8xi1>, vector<8x8xf32>
    %cst_11 = arith.constant dense<0xFF800000> : vector<8xf32>
    %22 = vector.multi_reduction <maximumf>, %21, %cst_11 [1] : vector<8x8xf32> to vector<8xf32>
    %23 = vector.shape_cast %22 : vector<8xf32> to vector<8x1xf32>
    %24 = vector.broadcast %23 : vector<8x1xf32> to vector<8x8xf32>
    %25 = arith.subf %21, %24 : vector<8x8xf32>
    %26 = math.exp %25 : vector<8x8xf32>
    %cst_12 = arith.constant dense<0.000000e+00> : vector<8xf32>
    %27 = vector.multi_reduction <add>, %26, %cst_12 [1] : vector<8x8xf32> to vector<8xf32>
    %28 = vector.shape_cast %27 : vector<8xf32> to vector<8x1xf32>
    %29 = tpu.reciprocal %28 : vector<8x1xf32> -> vector<8x1xf32>
    %30 = vector.broadcast %29 : vector<8x1xf32> to vector<8x8xf32>
    %31 = arith.mulf %26, %30 : vector<8x8xf32>
    %cst_13 = arith.constant dense<0.000000e+00> : vector<8x16xf32>
    %32 = tpu.matmul %31, %15, %cst_13 {dimension_numbers = #tpu.dot_dimension_numbers<[1], [0], [0], [1], [0, 0, 1, 1], [], []>} : vector<8x8xf32>, vector<8x16xf32>, vector<8x16xf32> -> vector<8x16xf32>
    %c0_14 = arith.constant 0 : index
    %c0_15 = arith.constant 0 : index
    %33 = vector.load %arg16[%c0_14, %c0_15] : memref<16x64xf32, #tpu.memory_space<vmem>>, vector<8x16xf32>
    tpu.vector_store %arg16[%c0_14, %c0_15], %32 {strides = array<i32>} : memref<16x64xf32, #tpu.memory_space<vmem>>, vector<8x16xf32>,
    %34 = vector.extract_strided_slice %10 {offsets = [0, 16], sizes = [8, 16], strides = [1, 1]} : vector<8x64xf32> to vector<8x16xf32>
    %35 = vector.extract_strided_slice %11 {offsets = [0, 16], sizes = [8, 16], strides = [1, 1]} : vector<8x64xf32> to vector<8x16xf32>
    %36 = vector.extract_strided_slice %12 {offsets = [0, 16], sizes = [8, 16], strides = [1, 1]} : vector<8x64xf32> to vector<8x16xf32>
    %37 = tpu.transpose %35, [1, 0] : vector<8x16xf32> -> vector<16x8xf32>
    %cst_16 = arith.constant dense<0.000000e+00> : vector<8x8xf32>
    %38 = tpu.matmul %34, %37, %cst_16 {dimension_numbers = #tpu.dot_dimension_numbers<[1], [0], [0], [1], [0, 0, 1, 1], [], []>} : vector<8x16xf32>, vector<16x8xf32>, vector<8x8xf32> -> vector<8x8xf32>
    %cst_17 = arith.constant 0.353553385 : f32
    %39 = vector.broadcast %cst_17 : f32 to vector<8x8xf32>
    %40 = arith.mulf %38, %39 : vector<8x8xf32>
    %cst_18 = arith.constant -1.000000e+09 : f32
    %41 = vector.broadcast %cst_18 : f32 to vector<8x8xf32>
    %42 = arith.select %9, %41, %40 : vector<8x8xi1>, vector<8x8xf32>
    %cst_19 = arith.constant dense<0xFF800000> : vector<8xf32>
    %43 = vector.multi_reduction <maximumf>, %42, %cst_19 [1] : vector<8x8xf32> to vector<8xf32>
    %44 = vector.shape_cast %43 : vector<8xf32> to vector<8x1xf32>
    %45 = vector.broadcast %44 : vector<8x1xf32> to vector<8x8xf32>
    %46 = arith.subf %42, %45 : vector<8x8xf32>
    %47 = math.exp %46 : vector<8x8xf32>
    %cst_20 = arith.constant dense<0.000000e+00> : vector<8xf32>
    %48 = vector.multi_reduction <add>, %47, %cst_20 [1] : vector<8x8xf32> to vector<8xf32>
    %49 = vector.shape_cast %48 : vector<8xf32> to vector<8x1xf32>
    %50 = tpu.reciprocal %49 : vector<8x1xf32> -> vector<8x1xf32>
    %51 = vector.broadcast %50 : vector<8x1xf32> to vector<8x8xf32>
    %52 = arith.mulf %47, %51 : vector<8x8xf32>
    %cst_21 = arith.constant dense<0.000000e+00> : vector<8x16xf32>
    %53 = tpu.matmul %52, %36, %cst_21 {dimension_numbers = #tpu.dot_dimension_numbers<[1], [0], [0], [1], [0, 0, 1, 1], [], []>} : vector<8x8xf32>, vector<8x16xf32>, vector<8x16xf32> -> vector<8x16xf32>
    %c0_22 = arith.constant 0 : index
    %c16 = arith.constant 16 : index
    %54 = vector.load %arg16[%c0_22, %c16] : memref<16x64xf32, #tpu.memory_space<vmem>>, vector<8x16xf32>
    tpu.vector_store %arg16[%c0_22, %c16], %53 {strides = array<i32>} : memref<16x64xf32, #tpu.memory_space<vmem>>, vector<8x16xf32>,
    %55 = vector.extract_strided_slice %10 {offsets = [0, 32], sizes = [8, 16], strides = [1, 1]} : vector<8x64xf32> to vector<8x16xf32>
    %56 = vector.extract_strided_slice %11 {offsets = [0, 32], sizes = [8, 16], strides = [1, 1]} : vector<8x64xf32> to vector<8x16xf32>
    %57 = vector.extract_strided_slice %12 {offsets = [0, 32], sizes = [8, 16], strides = [1, 1]} : vector<8x64xf32> to vector<8x16xf32>
    %58 = tpu.transpose %56, [1, 0] : vector<8x16xf32> -> vector<16x8xf32>
    %cst_23 = arith.constant dense<0.000000e+00> : vector<8x8xf32>
    %59 = tpu.matmul %55, %58, %cst_23 {dimension_numbers = #tpu.dot_dimension_numbers<[1], [0], [0], [1], [0, 0, 1, 1], [], []>} : vector<8x16xf32>, vector<16x8xf32>, vector<8x8xf32> -> vector<8x8xf32>
    %cst_24 = arith.constant 0.353553385 : f32
    %60 = vector.broadcast %cst_24 : f32 to vector<8x8xf32>
    %61 = arith.mulf %59, %60 : vector<8x8xf32>
    %cst_25 = arith.constant -1.000000e+09 : f32
    %62 = vector.broadcast %cst_25 : f32 to vector<8x8xf32>
    %63 = arith.select %9, %62, %61 : vector<8x8xi1>, vector<8x8xf32>
    %cst_26 = arith.constant dense<0xFF800000> : vector<8xf32>
    %64 = vector.multi_reduction <maximumf>, %63, %cst_26 [1] : vector<8x8xf32> to vector<8xf32>
    %65 = vector.shape_cast %64 : vector<8xf32> to vector<8x1xf32>
    %66 = vector.broadcast %65 : vector<8x1xf32> to vector<8x8xf32>
    %67 = arith.subf %63, %66 : vector<8x8xf32>
    %68 = math.exp %67 : vector<8x8xf32>
    %cst_27 = arith.constant dense<0.000000e+00> : vector<8xf32>
    %69 = vector.multi_reduction <add>, %68, %cst_27 [1] : vector<8x8xf32> to vector<8xf32>
    %70 = vector.shape_cast %69 : vector<8xf32> to vector<8x1xf32>
    %71 = tpu.reciprocal %70 : vector<8x1xf32> -> vector<8x1xf32>
    %72 = vector.broadcast %71 : vector<8x1xf32> to vector<8x8xf32>
    %73 = arith.mulf %68, %72 : vector<8x8xf32>
    %cst_28 = arith.constant dense<0.000000e+00> : vector<8x16xf32>
    %74 = tpu.matmul %73, %57, %cst_28 {dimension_numbers = #tpu.dot_dimension_numbers<[1], [0], [0], [1], [0, 0, 1, 1], [], []>} : vector<8x8xf32>, vector<8x16xf32>, vector<8x16xf32> -> vector<8x16xf32>
    %c0_29 = arith.constant 0 : index
    %c32 = arith.constant 32 : index
    %75 = vector.load %arg16[%c0_29, %c32] : memref<16x64xf32, #tpu.memory_space<vmem>>, vector<8x16xf32>
    tpu.vector_store %arg16[%c0_29, %c32], %74 {strides = array<i32>} : memref<16x64xf32, #tpu.memory_space<vmem>>, vector<8x16xf32>,
    %76 = vector.extract_strided_slice %10 {offsets = [0, 48], sizes = [8, 16], strides = [1, 1]} : vector<8x64xf32> to vector<8x16xf32>
    %77 = vector.extract_strided_slice %11 {offsets = [0, 48], sizes = [8, 16], strides = [1, 1]} : vector<8x64xf32> to vector<8x16xf32>
    %78 = vector.extract_strided_slice %12 {offsets = [0, 48], sizes = [8, 16], strides = [1, 1]} : vector<8x64xf32> to vector<8x16xf32>
    %79 = tpu.transpose %77, [1, 0] : vector<8x16xf32> -> vector<16x8xf32>
    %cst_30 = arith.constant dense<0.000000e+00> : vector<8x8xf32>
    %80 = tpu.matmul %76, %79, %cst_30 {dimension_numbers = #tpu.dot_dimension_numbers<[1], [0], [0], [1], [0, 0, 1, 1], [], []>} : vector<8x16xf32>, vector<16x8xf32>, vector<8x8xf32> -> vector<8x8xf32>
    %cst_31 = arith.constant 0.353553385 : f32
    %81 = vector.broadcast %cst_31 : f32 to vector<8x8xf32>
    %82 = arith.mulf %80, %81 : vector<8x8xf32>
    %cst_32 = arith.constant -1.000000e+09 : f32
    %83 = vector.broadcast %cst_32 : f32 to vector<8x8xf32>
    %84 = arith.select %9, %83, %82 : vector<8x8xi1>, vector<8x8xf32>
    %cst_33 = arith.constant dense<0xFF800000> : vector<8xf32>
    %85 = vector.multi_reduction <maximumf>, %84, %cst_33 [1] : vector<8x8xf32> to vector<8xf32>
    %86 = vector.shape_cast %85 : vector<8xf32> to vector<8x1xf32>
    %87 = vector.broadcast %86 : vector<8x1xf32> to vector<8x8xf32>
    %88 = arith.subf %84, %87 : vector<8x8xf32>
    %89 = math.exp %88 : vector<8x8xf32>
    %cst_34 = arith.constant dense<0.000000e+00> : vector<8xf32>
    %90 = vector.multi_reduction <add>, %89, %cst_34 [1] : vector<8x8xf32> to vector<8xf32>
    %91 = vector.shape_cast %90 : vector<8xf32> to vector<8x1xf32>
    %92 = tpu.reciprocal %91 : vector<8x1xf32> -> vector<8x1xf32>
    %93 = vector.broadcast %92 : vector<8x1xf32> to vector<8x8xf32>
    %94 = arith.mulf %89, %93 : vector<8x8xf32>
    %cst_35 = arith.constant dense<0.000000e+00> : vector<8x16xf32>
    %95 = tpu.matmul %94, %78, %cst_35 {dimension_numbers = #tpu.dot_dimension_numbers<[1], [0], [0], [1], [0, 0, 1, 1], [], []>} : vector<8x8xf32>, vector<8x16xf32>, vector<8x16xf32> -> vector<8x16xf32>
    %c0_36 = arith.constant 0 : index
    %c48 = arith.constant 48 : index
    %96 = vector.load %arg16[%c0_36, %c48] : memref<16x64xf32, #tpu.memory_space<vmem>>, vector<8x16xf32>
    tpu.vector_store %arg16[%c0_36, %c48], %95 {strides = array<i32>} : memref<16x64xf32, #tpu.memory_space<vmem>>, vector<8x16xf32>,
    %c1 = arith.constant 1 : index
    %c0_37 = arith.constant 0 : index
    %c0_38 = arith.constant 0 : index
    %97 = vector.load %arg2[%c1, %c0_37, %c0_38] : memref<2x8x8xi32, #tpu.memory_space<vmem>>, vector<1x8x8xi32>
    %98 = vector.shape_cast %97 : vector<1x8x8xi32> to vector<8x8xi32>
    %c0_i32_39 = arith.constant 0 : i32
    %99 = vector.broadcast %c0_i32_39 : i32 to vector<8x8xi32>
    %100 = arith.cmpi ne, %98, %99 : vector<8x8xi32>
    %101 = vector.extract_strided_slice %5 {offsets = [8, 0], sizes = [8, 64], strides = [1, 1]} : vector<16x192xf32> to vector<8x64xf32>
    %102 = vector.extract_strided_slice %5 {offsets = [8, 64], sizes = [8, 64], strides = [1, 1]} : vector<16x192xf32> to vector<8x64xf32>
    %103 = vector.extract_strided_slice %5 {offsets = [8, 128], sizes = [8, 64], strides = [1, 1]} : vector<16x192xf32> to vector<8x64xf32>
    %104 = vector.extract_strided_slice %101 {offsets = [0, 0], sizes = [8, 16], strides = [1, 1]} : vector<8x64xf32> to vector<8x16xf32>
    %105 = vector.extract_strided_slice %102 {offsets = [0, 0], sizes = [8, 16], strides = [1, 1]} : vector<8x64xf32> to vector<8x16xf32>
    %106 = vector.extract_strided_slice %103 {offsets = [0, 0], sizes = [8, 16], strides = [1, 1]} : vector<8x64xf32> to vector<8x16xf32>
    %107 = tpu.transpose %105, [1, 0] : vector<8x16xf32> -> vector<16x8xf32>
    %cst_40 = arith.constant dense<0.000000e+00> : vector<8x8xf32>
    %108 = tpu.matmul %104, %107, %cst_40 {dimension_numbers = #tpu.dot_dimension_numbers<[1], [0], [0], [1], [0, 0, 1, 1], [], []>} : vector<8x16xf32>, vector<16x8xf32>, vector<8x8xf32> -> vector<8x8xf32>
    %cst_41 = arith.constant 0.353553385 : f32
    %109 = vector.broadcast %cst_41 : f32 to vector<8x8xf32>
    %110 = arith.mulf %108, %109 : vector<8x8xf32>
    %cst_42 = arith.constant -1.000000e+09 : f32
    %111 = vector.broadcast %cst_42 : f32 to vector<8x8xf32>
    %112 = arith.select %100, %111, %110 : vector<8x8xi1>, vector<8x8xf32>
    %cst_43 = arith.constant dense<0xFF800000> : vector<8xf32>
    %113 = vector.multi_reduction <maximumf>, %112, %cst_43 [1] : vector<8x8xf32> to vector<8xf32>
    %114 = vector.shape_cast %113 : vector<8xf32> to vector<8x1xf32>
    %115 = vector.broadcast %114 : vector<8x1xf32> to vector<8x8xf32>
    %116 = arith.subf %112, %115 : vector<8x8xf32>
    %117 = math.exp %116 : vector<8x8xf32>
    %cst_44 = arith.constant dense<0.000000e+00> : vector<8xf32>
    %118 = vector.multi_reduction <add>, %117, %cst_44 [1] : vector<8x8xf32> to vector<8xf32>
    %119 = vector.shape_cast %118 : vector<8xf32> to vector<8x1xf32>
    %120 = tpu.reciprocal %119 : vector<8x1xf32> -> vector<8x1xf32>
    %121 = vector.broadcast %120 : vector<8x1xf32> to vector<8x8xf32>
    %122 = arith.mulf %117, %121 : vector<8x8xf32>
    %cst_45 = arith.constant dense<0.000000e+00> : vector<8x16xf32>
    %123 = tpu.matmul %122, %106, %cst_45 {dimension_numbers = #tpu.dot_dimension_numbers<[1], [0], [0], [1], [0, 0, 1, 1], [], []>} : vector<8x8xf32>, vector<8x16xf32>, vector<8x16xf32> -> vector<8x16xf32>
    %c8 = arith.constant 8 : index
    %c0_46 = arith.constant 0 : index
    %124 = vector.load %arg16[%c8, %c0_46] : memref<16x64xf32, #tpu.memory_space<vmem>>, vector<8x16xf32>
    tpu.vector_store %arg16[%c8, %c0_46], %123 {strides = array<i32>} : memref<16x64xf32, #tpu.memory_space<vmem>>, vector<8x16xf32>,
    %125 = vector.extract_strided_slice %101 {offsets = [0, 16], sizes = [8, 16], strides = [1, 1]} : vector<8x64xf32> to vector<8x16xf32>
    %126 = vector.extract_strided_slice %102 {offsets = [0, 16], sizes = [8, 16], strides = [1, 1]} : vector<8x64xf32> to vector<8x16xf32>
    %127 = vector.extract_strided_slice %103 {offsets = [0, 16], sizes = [8, 16], strides = [1, 1]} : vector<8x64xf32> to vector<8x16xf32>
    %128 = tpu.transpose %126, [1, 0] : vector<8x16xf32> -> vector<16x8xf32>
    %cst_47 = arith.constant dense<0.000000e+00> : vector<8x8xf32>
    %129 = tpu.matmul %125, %128, %cst_47 {dimension_numbers = #tpu.dot_dimension_numbers<[1], [0], [0], [1], [0, 0, 1, 1], [], []>} : vector<8x16xf32>, vector<16x8xf32>, vector<8x8xf32> -> vector<8x8xf32>
    %cst_48 = arith.constant 0.353553385 : f32
    %130 = vector.broadcast %cst_48 : f32 to vector<8x8xf32>
    %131 = arith.mulf %129, %130 : vector<8x8xf32>
    %cst_49 = arith.constant -1.000000e+09 : f32
    %132 = vector.broadcast %cst_49 : f32 to vector<8x8xf32>
    %133 = arith.select %100, %132, %131 : vector<8x8xi1>, vector<8x8xf32>
    %cst_50 = arith.constant dense<0xFF800000> : vector<8xf32>
    %134 = vector.multi_reduction <maximumf>, %133, %cst_50 [1] : vector<8x8xf32> to vector<8xf32>
    %135 = vector.shape_cast %134 : vector<8xf32> to vector<8x1xf32>
    %136 = vector.broadcast %135 : vector<8x1xf32> to vector<8x8xf32>
    %137 = arith.subf %133, %136 : vector<8x8xf32>
    %138 = math.exp %137 : vector<8x8xf32>
    %cst_51 = arith.constant dense<0.000000e+00> : vector<8xf32>
    %139 = vector.multi_reduction <add>, %138, %cst_51 [1] : vector<8x8xf32> to vector<8xf32>
    %140 = vector.shape_cast %139 : vector<8xf32> to vector<8x1xf32>
    %141 = tpu.reciprocal %140 : vector<8x1xf32> -> vector<8x1xf32>
    %142 = vector.broadcast %141 : vector<8x1xf32> to vector<8x8xf32>
    %143 = arith.mulf %138, %142 : vector<8x8xf32>
    %cst_52 = arith.constant dense<0.000000e+00> : vector<8x16xf32>
    %144 = tpu.matmul %143, %127, %cst_52 {dimension_numbers = #tpu.dot_dimension_numbers<[1], [0], [0], [1], [0, 0, 1, 1], [], []>} : vector<8x8xf32>, vector<8x16xf32>, vector<8x16xf32> -> vector<8x16xf32>
    %c8_53 = arith.constant 8 : index
    %c16_54 = arith.constant 16 : index
    %145 = vector.load %arg16[%c8_53, %c16_54] : memref<16x64xf32, #tpu.memory_space<vmem>>, vector<8x16xf32>
    tpu.vector_store %arg16[%c8_53, %c16_54], %144 {strides = array<i32>} : memref<16x64xf32, #tpu.memory_space<vmem>>, vector<8x16xf32>,
    %146 = vector.extract_strided_slice %101 {offsets = [0, 32], sizes = [8, 16], strides = [1, 1]} : vector<8x64xf32> to vector<8x16xf32>
    %147 = vector.extract_strided_slice %102 {offsets = [0, 32], sizes = [8, 16], strides = [1, 1]} : vector<8x64xf32> to vector<8x16xf32>
    %148 = vector.extract_strided_slice %103 {offsets = [0, 32], sizes = [8, 16], strides = [1, 1]} : vector<8x64xf32> to vector<8x16xf32>
    %149 = tpu.transpose %147, [1, 0] : vector<8x16xf32> -> vector<16x8xf32>
    %cst_55 = arith.constant dense<0.000000e+00> : vector<8x8xf32>
    %150 = tpu.matmul %146, %149, %cst_55 {dimension_numbers = #tpu.dot_dimension_numbers<[1], [0], [0], [1], [0, 0, 1, 1], [], []>} : vector<8x16xf32>, vector<16x8xf32>, vector<8x8xf32> -> vector<8x8xf32>
    %cst_56 = arith.constant 0.353553385 : f32
    %151 = vector.broadcast %cst_56 : f32 to vector<8x8xf32>
    %152 = arith.mulf %150, %151 : vector<8x8xf32>
    %cst_57 = arith.constant -1.000000e+09 : f32
    %153 = vector.broadcast %cst_57 : f32 to vector<8x8xf32>
    %154 = arith.select %100, %153, %152 : vector<8x8xi1>, vector<8x8xf32>
    %cst_58 = arith.constant dense<0xFF800000> : vector<8xf32>
    %155 = vector.multi_reduction <maximumf>, %154, %cst_58 [1] : vector<8x8xf32> to vector<8xf32>
    %156 = vector.shape_cast %155 : vector<8xf32> to vector<8x1xf32>
    %157 = vector.broadcast %156 : vector<8x1xf32> to vector<8x8xf32>
    %158 = arith.subf %154, %157 : vector<8x8xf32>
    %159 = math.exp %158 : vector<8x8xf32>
    %cst_59 = arith.constant dense<0.000000e+00> : vector<8xf32>
    %160 = vector.multi_reduction <add>, %159, %cst_59 [1] : vector<8x8xf32> to vector<8xf32>
    %161 = vector.shape_cast %160 : vector<8xf32> to vector<8x1xf32>
    %162 = tpu.reciprocal %161 : vector<8x1xf32> -> vector<8x1xf32>
    %163 = vector.broadcast %162 : vector<8x1xf32> to vector<8x8xf32>
    %164 = arith.mulf %159, %163 : vector<8x8xf32>
    %cst_60 = arith.constant dense<0.000000e+00> : vector<8x16xf32>
    %165 = tpu.matmul %164, %148, %cst_60 {dimension_numbers = #tpu.dot_dimension_numbers<[1], [0], [0], [1], [0, 0, 1, 1], [], []>} : vector<8x8xf32>, vector<8x16xf32>, vector<8x16xf32> -> vector<8x16xf32>
    %c8_61 = arith.constant 8 : index
    %c32_62 = arith.constant 32 : index
    %166 = vector.load %arg16[%c8_61, %c32_62] : memref<16x64xf32, #tpu.memory_space<vmem>>, vector<8x16xf32>
    tpu.vector_store %arg16[%c8_61, %c32_62], %165 {strides = array<i32>} : memref<16x64xf32, #tpu.memory_space<vmem>>, vector<8x16xf32>,
    %167 = vector.extract_strided_slice %101 {offsets = [0, 48], sizes = [8, 16], strides = [1, 1]} : vector<8x64xf32> to vector<8x16xf32>
    %168 = vector.extract_strided_slice %102 {offsets = [0, 48], sizes = [8, 16], strides = [1, 1]} : vector<8x64xf32> to vector<8x16xf32>
    %169 = vector.extract_strided_slice %103 {offsets = [0, 48], sizes = [8, 16], strides = [1, 1]} : vector<8x64xf32> to vector<8x16xf32>
    %170 = tpu.transpose %168, [1, 0] : vector<8x16xf32> -> vector<16x8xf32>
    %cst_63 = arith.constant dense<0.000000e+00> : vector<8x8xf32>
    %171 = tpu.matmul %167, %170, %cst_63 {dimension_numbers = #tpu.dot_dimension_numbers<[1], [0], [0], [1], [0, 0, 1, 1], [], []>} : vector<8x16xf32>, vector<16x8xf32>, vector<8x8xf32> -> vector<8x8xf32>
    %cst_64 = arith.constant 0.353553385 : f32
    %172 = vector.broadcast %cst_64 : f32 to vector<8x8xf32>
    %173 = arith.mulf %171, %172 : vector<8x8xf32>
    %cst_65 = arith.constant -1.000000e+09 : f32
    %174 = vector.broadcast %cst_65 : f32 to vector<8x8xf32>
    %175 = arith.select %100, %174, %173 : vector<8x8xi1>, vector<8x8xf32>
    %cst_66 = arith.constant dense<0xFF800000> : vector<8xf32>
    %176 = vector.multi_reduction <maximumf>, %175, %cst_66 [1] : vector<8x8xf32> to vector<8xf32>
    %177 = vector.shape_cast %176 : vector<8xf32> to vector<8x1xf32>
    %178 = vector.broadcast %177 : vector<8x1xf32> to vector<8x8xf32>
    %179 = arith.subf %175, %178 : vector<8x8xf32>
    %180 = math.exp %179 : vector<8x8xf32>
    %cst_67 = arith.constant dense<0.000000e+00> : vector<8xf32>
    %181 = vector.multi_reduction <add>, %180, %cst_67 [1] : vector<8x8xf32> to vector<8xf32>
    %182 = vector.shape_cast %181 : vector<8xf32> to vector<8x1xf32>
    %183 = tpu.reciprocal %182 : vector<8x1xf32> -> vector<8x1xf32>
    %184 = vector.broadcast %183 : vector<8x1xf32> to vector<8x8xf32>
    %185 = arith.mulf %180, %184 : vector<8x8xf32>
    %cst_68 = arith.constant dense<0.000000e+00> : vector<8x16xf32>
    %186 = tpu.matmul %185, %169, %cst_68 {dimension_numbers = #tpu.dot_dimension_numbers<[1], [0], [0], [1], [0, 0, 1, 1], [], []>} : vector<8x8xf32>, vector<8x16xf32>, vector<8x16xf32> -> vector<8x16xf32>
    %c8_69 = arith.constant 8 : index
    %c48_70 = arith.constant 48 : index
    %187 = vector.load %arg16[%c8_69, %c48_70] : memref<16x64xf32, #tpu.memory_space<vmem>>, vector<8x16xf32>
    tpu.vector_store %arg16[%c8_69, %c48_70], %186 {strides = array<i32>} : memref<16x64xf32, #tpu.memory_space<vmem>>, vector<8x16xf32>,
    %c0_71 = arith.constant 0 : index
    %c0_72 = arith.constant 0 : index
    %188 = vector.load %arg16[%c0_71, %c0_72] : memref<16x64xf32, #tpu.memory_space<vmem>>, vector<16x64xf32>
    %c0_73 = arith.constant 0 : index
    %c0_74 = arith.constant 0 : index
    %189 = vector.load %arg5[%c0_73, %c0_74] : memref<64x32xf32, #tpu.memory_space<vmem>>, vector<64x32xf32>
    %cst_75 = arith.constant dense<0.000000e+00> : vector<16x32xf32>
    %190 = tpu.matmul %188, %189, %cst_75 {dimension_numbers = #tpu.dot_dimension_numbers<[1], [0], [0], [1], [0, 0, 1, 1], [], []>} : vector<16x64xf32>, vector<64x32xf32>, vector<16x32xf32> -> vector<16x32xf32>
    %c0_76 = arith.constant 0 : index
    %c0_77 = arith.constant 0 : index
    %191 = vector.load %arg6[%c0_76, %c0_77] : memref<1x32xf32, #tpu.memory_space<vmem>>, vector<1x32xf32>
    %192 = vector.broadcast %191 : vector<1x32xf32> to vector<16x32xf32>
    %193 = arith.addf %190, %192 : vector<16x32xf32>
    %c0_78 = arith.constant 0 : index
    %c0_79 = arith.constant 0 : index
    %194 = vector.load %arg7[%c0_78, %c0_79] : memref<1x32xf32, #tpu.memory_space<vmem>>, vector<1x32xf32>
    %c0_80 = arith.constant 0 : index
    %c0_81 = arith.constant 0 : index
    %195 = vector.load %arg8[%c0_80, %c0_81] : memref<1x32xf32, #tpu.memory_space<vmem>>, vector<1x32xf32>
    %cst_82 = arith.constant dense<0.000000e+00> : vector<16xf32>
    %196 = vector.multi_reduction <add>, %193, %cst_82 [1] : vector<16x32xf32> to vector<16xf32>
    %197 = vector.shape_cast %196 : vector<16xf32> to vector<16x1xf32>
    %cst_83 = arith.constant 3.200000e+01 : f32
    %198 = vector.broadcast %cst_83 : f32 to vector<16x1xf32>
    %199 = arith.divf %197, %198 : vector<16x1xf32>
    %200 = vector.broadcast %199 : vector<16x1xf32> to vector<16x32xf32>
    %201 = arith.subf %193, %200 : vector<16x32xf32>
    %202 = arith.mulf %201, %201 : vector<16x32xf32>
    %cst_84 = arith.constant dense<0.000000e+00> : vector<16xf32>
    %203 = vector.multi_reduction <add>, %202, %cst_84 [1] : vector<16x32xf32> to vector<16xf32>
    %204 = vector.shape_cast %203 : vector<16xf32> to vector<16x1xf32>
    %cst_85 = arith.constant 3.200000e+01 : f32
    %205 = vector.broadcast %cst_85 : f32 to vector<16x1xf32>
    %206 = arith.divf %204, %205 : vector<16x1xf32>
    %207 = vector.broadcast %199 : vector<16x1xf32> to vector<16x32xf32>
    %208 = arith.subf %193, %207 : vector<16x32xf32>
    %cst_86 = arith.constant 9.99999974E-6 : f32
    %209 = vector.broadcast %cst_86 : f32 to vector<16x1xf32>
    %210 = arith.addf %206, %209 : vector<16x1xf32>
    %211 = math.rsqrt %210 : vector<16x1xf32>
    %212 = vector.broadcast %211 : vector<16x1xf32> to vector<16x32xf32>
    %213 = arith.mulf %208, %212 : vector<16x32xf32>
    %214 = vector.broadcast %194 : vector<1x32xf32> to vector<16x32xf32>
    %215 = arith.mulf %213, %214 : vector<16x32xf32>
    %216 = vector.broadcast %195 : vector<1x32xf32> to vector<16x32xf32>
    %217 = arith.addf %215, %216 : vector<16x32xf32>
    %c0_87 = arith.constant 0 : index
    %c0_88 = arith.constant 0 : index
    %218 = vector.load %arg9[%c0_87, %c0_88] : memref<32x16xf32, #tpu.memory_space<vmem>>, vector<32x16xf32>
    %cst_89 = arith.constant dense<0.000000e+00> : vector<16x16xf32>
    %219 = tpu.matmul %217, %218, %cst_89 {dimension_numbers = #tpu.dot_dimension_numbers<[1], [0], [0], [1], [0, 0, 1, 1], [], []>} : vector<16x32xf32>, vector<32x16xf32>, vector<16x16xf32> -> vector<16x16xf32>
    %c0_90 = arith.constant 0 : index
    %c0_91 = arith.constant 0 : index
    %220 = vector.load %arg10[%c0_90, %c0_91] : memref<1x16xf32, #tpu.memory_space<vmem>>, vector<1x16xf32>
    %221 = vector.broadcast %220 : vector<1x16xf32> to vector<16x16xf32>
    %222 = arith.addf %219, %221 : vector<16x16xf32>
    %cst_92 = arith.constant 5.000000e-01 : f32
    %223 = vector.broadcast %cst_92 : f32 to vector<16x16xf32>
    %224 = arith.mulf %223, %222 : vector<16x16xf32>
    %cst_93 = arith.constant 0.707106769 : f32
    %225 = vector.broadcast %cst_93 : f32 to vector<16x16xf32>
    %226 = arith.mulf %222, %225 : vector<16x16xf32>
    %227 = math.erf %226 : vector<16x16xf32>
    %cst_94 = arith.constant 1.000000e+00 : f32
    %228 = vector.broadcast %cst_94 : f32 to vector<16x16xf32>
    %229 = arith.addf %228, %227 : vector<16x16xf32>
    %230 = arith.mulf %224, %229 : vector<16x16xf32>
    %c0_95 = arith.constant 0 : index
    %c0_96 = arith.constant 0 : index
    %231 = vector.load %arg11[%c0_95, %c0_96] : memref<16x32xf32, #tpu.memory_space<vmem>>, vector<16x32xf32>
    %cst_97 = arith.constant dense<0.000000e+00> : vector<16x32xf32>
    %232 = tpu.matmul %230, %231, %cst_97 {dimension_numbers = #tpu.dot_dimension_numbers<[1], [0], [0], [1], [0, 0, 1, 1], [], []>} : vector<16x16xf32>, vector<16x32xf32>, vector<16x32xf32> -> vector<16x32xf32>
    %c0_98 = arith.constant 0 : index
    %c0_99 = arith.constant 0 : index
    %233 = vector.load %arg12[%c0_98, %c0_99] : memref<1x32xf32, #tpu.memory_space<vmem>>, vector<1x32xf32>
    %234 = vector.broadcast %233 : vector<1x32xf32> to vector<16x32xf32>
    %235 = arith.addf %232, %234 : vector<16x32xf32>
    %c0_100 = arith.constant 0 : index
    %c0_101 = arith.constant 0 : index
    %236 = vector.load %arg13[%c0_100, %c0_101] : memref<1x32xf32, #tpu.memory_space<vmem>>, vector<1x32xf32>
    %c0_102 = arith.constant 0 : index
    %c0_103 = arith.constant 0 : index
    %237 = vector.load %arg14[%c0_102, %c0_103] : memref<1x32xf32, #tpu.memory_space<vmem>>, vector<1x32xf32>
    %cst_104 = arith.constant dense<0.000000e+00> : vector<16xf32>
    %238 = vector.multi_reduction <add>, %235, %cst_104 [1] : vector<16x32xf32> to vector<16xf32>
    %239 = vector.shape_cast %238 : vector<16xf32> to vector<16x1xf32>
    %cst_105 = arith.constant 3.200000e+01 : f32
    %240 = vector.broadcast %cst_105 : f32 to vector<16x1xf32>
    %241 = arith.divf %239, %240 : vector<16x1xf32>
    %242 = vector.broadcast %241 : vector<16x1xf32> to vector<16x32xf32>
    %243 = arith.subf %235, %242 : vector<16x32xf32>
    %244 = arith.mulf %243, %243 : vector<16x32xf32>
    %cst_106 = arith.constant dense<0.000000e+00> : vector<16xf32>
    %245 = vector.multi_reduction <add>, %244, %cst_106 [1] : vector<16x32xf32> to vector<16xf32>
    %246 = vector.shape_cast %245 : vector<16xf32> to vector<16x1xf32>
    %cst_107 = arith.constant 3.200000e+01 : f32
    %247 = vector.broadcast %cst_107 : f32 to vector<16x1xf32>
    %248 = arith.divf %246, %247 : vector<16x1xf32>
    %249 = vector.broadcast %241 : vector<16x1xf32> to vector<16x32xf32>
    %250 = arith.subf %235, %249 : vector<16x32xf32>
    %cst_108 = arith.constant 9.99999974E-6 : f32
    %251 = vector.broadcast %cst_108 : f32 to vector<16x1xf32>
    %252 = arith.addf %248, %251 : vector<16x1xf32>
    %253 = math.rsqrt %252 : vector<16x1xf32>
    %254 = vector.broadcast %253 : vector<16x1xf32> to vector<16x32xf32>
    %255 = arith.mulf %250, %254 : vector<16x32xf32>
    %256 = vector.broadcast %236 : vector<1x32xf32> to vector<16x32xf32>
    %257 = arith.mulf %255, %256 : vector<16x32xf32>
    %258 = vector.broadcast %237 : vector<1x32xf32> to vector<16x32xf32>
    %259 = arith.addf %257, %258 : vector<16x32xf32>
    %c0_109 = arith.constant 0 : index
    %c0_110 = arith.constant 0 : index
    %260 = vector.load %arg15[%c0_109, %c0_110] : memref<16x32xf32, #tpu.memory_space<vmem>>, vector<16x32xf32>
    tpu.vector_store %arg15[%c0_109, %c0_110], %259 {strides = array<i32>} : memref<16x32xf32, #tpu.memory_space<vmem>>, vector<16x32xf32>,
    return
  }
  func.func @transform_0(%arg0: i32) -> (i32, i32) {
    %c0_i32 = arith.constant 0 : i32
    %c0_i32_0 = arith.constant 0 : i32
    return %arg0, %c0_i32 : i32, i32
  }
  func.func @transform_1(%arg0: i32) -> (i32, i32, i32) {
    %c0_i32 = arith.constant 0 : i32
    %c0_i32_0 = arith.constant 0 : i32
    %c0_i32_1 = arith.constant 0 : i32
    return %arg0, %c0_i32, %c0_i32_0 : i32, i32, i32
  }
  func.func @transform_2(%arg0: i32) -> (i32, i32) {
    %c0_i32 = arith.constant 0 : i32
    %c0_i32_0 = arith.constant 0 : i32
    %c0_i32_1 = arith.constant 0 : i32
    return %c0_i32, %c0_i32_0 : i32, i32
  }
  func.func @transform_3(%arg0: i32) -> (i32, i32) {
    %c0_i32 = arith.constant 0 : i32
    %c0_i32_0 = arith.constant 0 : i32
    %c0_i32_1 = arith.constant 0 : i32
    return %c0_i32, %c0_i32_0 : i32, i32
  }
  func.func @transform_4(%arg0: i32) -> (i32, i32) {
    %c0_i32 = arith.constant 0 : i32
    %c0_i32_0 = arith.constant 0 : i32
    %c0_i32_1 = arith.constant 0 : i32
    return %c0_i32, %c0_i32_0 : i32, i32
  }
  func.func @transform_5(%arg0: i32) -> (i32, i32) {
    %c0_i32 = arith.constant 0 : i32
    %c0_i32_0 = arith.constant 0 : i32
    %c0_i32_1 = arith.constant 0 : i32
    return %c0_i32, %c0_i32_0 : i32, i32
  }
  func.func @transform_6(%arg0: i32) -> (i32, i32) {
    %c0_i32 = arith.constant 0 : i32
    %c0_i32_0 = arith.constant 0 : i32
    %c0_i32_1 = arith.constant 0 : i32
    return %c0_i32, %c0_i32_0 : i32, i32
  }
  func.func @transform_7(%arg0: i32) -> (i32, i32) {
    %c0_i32 = arith.constant 0 : i32
    %c0_i32_0 = arith.constant 0 : i32
    %c0_i32_1 = arith.constant 0 : i32
    return %c0_i32, %c0_i32_0 : i32, i32
  }
  func.func @transform_8(%arg0: i32) -> (i32, i32) {
    %c0_i32 = arith.constant 0 : i32
    %c0_i32_0 = arith.constant 0 : i32
    %c0_i32_1 = arith.constant 0 : i32
    return %c0_i32, %c0_i32_0 : i32, i32
  }
  func.func @transform_9(%arg0: i32) -> (i32, i32) {
    %c0_i32 = arith.constant 0 : i32
    %c0_i32_0 = arith.constant 0 : i32
    %c0_i32_1 = arith.constant 0 : i32
    return %c0_i32, %c0_i32_0 : i32, i32
  }
  func.func @transform_10(%arg0: i32) -> (i32, i32) {
    %c0_i32 = arith.constant 0 : i32
    %c0_i32_0 = arith.constant 0 : i32
    %c0_i32_1 = arith.constant 0 : i32
    return %c0_i32, %c0_i32_0 : i32, i32
  }
  func.func @transform_11(%arg0: i32) -> (i32, i32) {
    %c0_i32 = arith.constant 0 : i32
    %c0_i32_0 = arith.constant 0 : i32
    %c0_i32_1 = arith.constant 0 : i32
    return %c0_i32, %c0_i32_0 : i32, i32
  }
  func.func @transform_12(%arg0: i32) -> (i32, i32) {
    %c0_i32 = arith.constant 0 : i32
    %c0_i32_0 = arith.constant 0 : i32
    %c0_i32_1 = arith.constant 0 : i32
    return %c0_i32, %c0_i32_0 : i32, i32
  }
  func.func @transform_13(%arg0: i32) -> (i32, i32) {
    %c0_i32 = arith.constant 0 : i32
    %c0_i32_0 = arith.constant 0 : i32
    %c0_i32_1 = arith.constant 0 : i32
    return %c0_i32, %c0_i32_0 : i32, i32
  }
  func.func @transform_14(%arg0: i32) -> (i32, i32) {
    %c0_i32 = arith.constant 0 : i32
    %c0_i32_0 = arith.constant 0 : i32
    return %arg0, %c0_i32 : i32, i32
  }
}

</mosaic_0001>

<bundles_post_ra>
// kernel: tpu_custom_call.1
= control target key start
LH: loop header
LB: loop body
LE: loop exit
PB: predicated region body
PF: predicated region fallthrough
CT: control target
= control target key end

     0   :  { %vm64_vm0 = vcmask 261120   ;;  %s1692_s0 = inlined_call_operand.vmem [shape: f32[16,32], index: 0, kind: input, shape index: {}]   ;;  %s1693_s1 = inlined_call_operand.vmem [shape: s32[2,8,8], index: 1, kind: input, shape index: {}]   ;;  %s1694_s2 = inlined_call_operand.vmem [shape: f32[32,192], index: 2, kind: input, shape index: {}]   ;;  %s1695_s3 = inlined_call_operand.vmem [shape: f32[1,192], index: 3, kind: input, shape index: {}]   ;;  %s1696_s4 = inlined_call_operand.vmem [shape: f32[64,32], index: 4, kind: input, shape index: {}]   ;;  %s1697_s5 = inlined_call_operand.vmem [shape: f32[1,32], index: 5, kind: input, shape index: {}]   ;;  %s1698_s6 = inlined_call_operand.vmem [shape: f32[1,32], index: 6, kind: input, shape index: {}]   ;;  %s1699_s7 = inlined_call_operand.vmem [shape: f32[1,32], index: 7, kind: input, shape index: {}]   ;;  %s1700_s8 = inlined_call_operand.vmem [shape: f32[32,16], index: 8, kind: input, shape index: {}]   ;;  %s1701_s9 = inlined_call_operand.vmem [shape: f32[1,16], index: 9, kind: input, shape index: {}]   ;;  %s1702_s10 = inlined_call_operand.vmem [shape: f32[16,32], index: 10, kind: input, shape index: {}]   ;;  %s1703_s11 = inlined_call_operand.vmem [shape: f32[1,32], index: 11, kind: input, shape index: {}]   ;;  %s1704_s12 = inlined_call_operand.vmem [shape: f32[1,32], index: 12, kind: input, shape index: {}]   ;;  %s1705_s13 = inlined_call_operand.vmem [shape: f32[1,32], index: 13, kind: input, shape index: {}]   ;;  %s1706_s14 = inlined_call_operand.hbm [shape: f32[16,32], index: 14, kind: output, shape index: {}]  }
   0x1   :  { %v56_v0 = vld [vmem:[%s1694_s2 + $0x30] sm:$0xff]  ;;  %v54_v1 = vld [vmem:[%s1694_s2 + $0x20] sm:$0xff]  ;;  %v57_v3 = vld [vmem:[%s1694_s2 + $0x38] sm:$0xff] }
   0x2   :  { %83 = vmatpush.msra.mxu0 %v56_v0  ;;  %v52_v2 = vld [vmem:[%s1694_s2 + $0x10] sm:$0xff]  ;;  %v55_v4 = vld [vmem:[%s1694_s2 + $0x28] sm:$0xff]  ;;  %v50_v5 = vld [vmem:[%s1694_s2] sm:$0xff]  ;;  %106 = vmatpush.msra.mxu1 %v57_v3 }
   0x3   :  { %v48_v6 = vld [vmem:[%s1692_s0] sm:$0xff]  ;;  %v53_v7 = vld [vmem:[%s1694_s2 + $0x18] sm:$0xff]  ;;  %v51_v8 = vld [vmem:[%s1694_s2 + $0x8] sm:$0xff] }
   0x4   :  { %84 = vmatpush.msra.mxu0 %v54_v1  ;;  %107 = vmatpush.msra.mxu1 %v55_v4 }
   0x6   :  { %85 = vmatpush.msra.mxu0 %v52_v2 }
   0x7   :  { %19 = vsyncpa [#allocation4], 0  ;;  %108 = vmatpush.msra.mxu1 %v53_v7  ;;  %v49_v9 = vld [vmem:[%s1692_s0 + $0x8] sm:$0xff]  ;;  %v1386_v10 = vld [vmem:[%s1695_s3] sm:$0x3]  ;;  %s1263_s2 = smov 32  }
   0x8   :  { %86 = vmatpush.msra.mxu0 %v50_v5  ;;  %v60_v11 = vperm.slane %v1386_v10, 0  ;;  %s1264_s19 = smov 48   ;;  %v61_v14 = vperm.slane %v1386_v10, 1  ;;  %s1265_s0 = smov 64   ;;  %vm122_vm1 = vcmask 130048   ;;  %v1424_v27 = vld [vmem:[%s1693_s1] sm:$0xff] }
   0x9   :  { %1136 = vmatmul.msk.f32.vlgmr.msra.gmra.mxu0 %vm64_vm0, %v48_v6  ;;  %109 = vmatpush.msra.mxu1 %v51_v8  ;;  %s1266_s3 = smov 112   ;;  %s1267_s20 = smov 80   ;;  %vm118_vm2 = vcmp.ne.s32.totalorder %v1424_v27, 0  ;;  %vm149_vm3 = vcmask 64512  }
   0xa   :  { %1138 = vmatmul.msk.f32.vlgmr.msra.gmra.mxu1 %vm64_vm0, %v48_v6  ;;  %s1268_s21 = smov 96   ;;  %s1269_s22 = smov 16  }
   0xb   :  { %s1272_s23 = smov 128  }
  0x11   :  { %1137 = vmatmul.msk.f32.gmra.mxu0 %vm64_vm0, %v49_v9 }
  0x12   :  { %1139 = vmatmul.msk.f32.gmra.mxu1 %vm64_vm0, %v49_v9  ;;  %v1152_v9 = vld [vmem:[%s1693_s1 + $0x8] sm:$0xff] }
  0x13   :  { %vm459_vm8 = vcmp.ne.s32.totalorder %v1152_v9, 0 }
  0x86   :  { %v88_v12 = vpop.f32.mrf.mxu0 }
  0x87   :  { %v89_v13 = vadd.f32 %v88_v12, %v60_v11  ;;  %v111_v15 = vpop.f32.mrf.mxu1 }
  0x88   :  { %v1394_v16 = vadd.f32 %v111_v15, %v61_v14 }
  0x89   :  { %287 = vrot.lane.b32.xlu2 %v89_v13, %s1263_s2  ;;  %200 = vrot.lane.b32.xlu1 %v89_v13, %s1264_s19 }
  0x8a   :  { %120 = vrot.lane.b32.xlu0 %v89_v13, %s1265_s0  ;;  %192 = vmatpush.msra.mxu3 %v1394_v16 }
  0x8e   :  { %v91_v17 = vpop.f32.mrf.mxu0 }
  0x8f   :  { %v1400_v18 = vadd.f32 %v91_v17, %v60_v11  ;;  %v1443_v41 = vpop.f32.mrf.mxu1 }
  0x91   :  { %198 = vrot.lane.b32.xlu2 %v89_v13, %s1266_s3  ;;  %371 = vrot.lane.b32.xlu1 %v89_v13, %s1267_s20 }
  0x99   :  { %285 = vrot.lane.b32.xlu2 %v89_v13, %s1268_s21 }
  0xa1   :  { %461 = vrot.lane.b32.xlu2 %v1400_v18, %s1265_s0 }
  0xa9   :  { %373 = vrot.lane.b32.xlu2 %v89_v13, %s1269_s22 }
  0xb1   :  { %625 = vrot.lane.b32.xlu2 %v1400_v18, %s1263_s2 }
  0xb9   :  { %539 = vrot.lane.b32.xlu2 %v1400_v18, %s1264_s19 }
  0xc1   :  { %708 = vrot.lane.b32.xlu2 %v1400_v18, %s1267_s20 }
  0xe3   :  { %v288_v19 = vpop.permute.xlu2 %287 }
  0xe4   :  { %1146 = vmatpush.xpose.msk.msrb.mxu3 %vm122_vm1, %v288_v19 }
  0xeb   :  { %v199_v20 = vpop.permute.xlu2 %198 }
  0xf3   :  { %v1411_v21 = vpop.permute.xlu2 %285 }
  0xfb   :  { %v1413_v22 = vpop.permute.xlu2 %461  ;;  %v201_v23 = vpop.permute.xlu1 %200 }
  0xfc   :  { %v121_v24 = vpop.permute.xlu0 %120  ;;  %1143 = vmatpush.xpose.msk.msrb.mxu1 %vm122_vm1, %v201_v23 }
  0xfd   :  { %1140 = vmatpush.xpose.msk.msra.mxu2 %vm122_vm1, %v121_v24 }
  0xff   :  { %1144 = vmatmul.msk.f32.vlgmr.msrb.gmra.mxu1 %vm122_vm1, %v199_v20 }
 0x100   :  { %1141 = vmatmul.msk.f32.vlgmr.msra.gmra.mxu2 %vm122_vm1, %v89_v13 }
 0x103   :  { %v374_v25 = vpop.permute.xlu2 %373  ;;  %v372_v26 = vpop.permute.xlu1 %371 }
 0x104   :  { %1149 = vmatpush.xpose.msk.msrb.mxu0 %vm122_vm1, %v374_v25 }
 0x107   :  { %1150 = vmatmul.msk.f32.vlgmr.msrb.gmra.mxu0 %vm122_vm1, %v372_v26 }
 0x10b   :  { %v626_v44 = vpop.permute.xlu2 %625 }
 0x113   :  { %v540_v47 = vpop.permute.xlu2 %539 }
 0x114   :  { %1156 = vmatpush.xpose.msk.msra.mxu0 %vm122_vm1, %v540_v47 }
 0x11b   :  { %v709_v63 = vpop.permute.xlu2 %708 }
 0x17c   :  { %v223_v42 = vpop.f32.mrf.mxu1 }
 0x17d   :  { %v226_v43 = vmul.f32 0.35355338, %v223_v42 }
 0x17f   :  { %v227_v45 = vsel %vm118_vm2, -1e+09, %v226_v43 }
 0x180   :  { %v228_v46 = vsel %vm149_vm3, %v227_v45, -inf }
 0x183   :  { %v144_v28 = vpop.f32.mrf.mxu2 }
 0x184   :  { %v147_v29 = vmul.f32 0.35355338, %v144_v28  ;;  %v396_v32 = vpop.f32.mrf.mxu0 }
 0x185   :  { %v399_v33 = vmul.f32 0.35355338, %v396_v32 }
 0x186   :  { %v148_v30 = vsel %vm118_vm2, -1e+09, %v147_v29 }
 0x187   :  { %v150_v31 = vsel %vm149_vm3, %v148_v30, -inf  ;;  %v1434_v34 = vsel %vm118_vm2, -1e+09, %v399_v33 }
 0x188   :  { %151 = vmax.xlane.f32.xlu0 %v150_v31  ;;  %v401_v35 = vsel %vm149_vm3, %v1434_v34, -inf }
 0x19c   :  { %710 = vrot.lane.b32.xlu0 %v1400_v18, %s1269_s22 }
 0x1c6   :  { %402 = vmax.xlane.f32.xlu0 %v401_v35 }
 0x1fb   :  { %v152_v36 = vpop.xlane.xlu0 %151 }
 0x1fc   :  { %v153_v37 = vsub.f32 %v148_v30, %v152_v36 }
 0x1fe   :  { %v154_v38 = vmul.f32 1.442695, %v153_v37 }
 0x200   :  { %1191 = vpow2.f32 %v154_v38 }
 0x206   :  { %v1192_v39 = vpop.eup %1191 }
 0x207   :  { %v156_v40 = vsel %vm149_vm3, %v1192_v39, 0.0 }
 0x208   :  { %157 = vadd.xlane.f32.xlu1 %v156_v40 }
 0x20e   :  { %v711_v48 = vpop.permute.xlu0 %710 }
 0x20f   :  { %1162 = vmatpush.xpose.msk.msrb.mxu0 %vm122_vm1, %v711_v48 }
 0x221   :  { %623 = vrot.lane.b32.xlu1 %v1400_v18, %s1268_s21 }
 0x229   :  { %537 = vrot.lane.b32.xlu1 %v1400_v18, %s1266_s3 }
 0x239   :  { %v403_v1 = vpop.xlane.xlu0 %402 }
 0x23a   :  { %v404_v6 = vsub.f32 %v1434_v34, %v403_v1 }
 0x23c   :  { %v405_v13 = vmul.f32 1.442695, %v404_v6 }
 0x253   :  { %229 = vmax.xlane.f32.xlu1 %v228_v46 }
 0x27b   :  { %v158_v49 = vpop.xlane.xlu1 %157 }
 0x27c   :  { %1193 = vrcp.f32 %v158_v49  ;;  %v170_v53 = vand.u32 2147483648, %v158_v49  ;;  %v168_v55 = vand.u32 2147483647, %v158_v49  ;;  %vm164_vm5 = vweird.f32 %v158_v49 }
 0x27d   :  { %1195 = vpow2.f32 %v405_v13 }
 0x27e   :  { %v171_v57 = vor.u32 1.1754944e-38, %v170_v53  ;;  %vm169_vm7 = vcmp.eq.f32.partialorder %v168_v55, 8.507059e+37 }
 0x282   :  { %v1194_v50 = vpop.eup %1193 }
 0x283   :  { %v160_v51 = vmul.f32 %v1194_v50, %v158_v49  ;;  %vm165_vm4 = vweird.f32 %v1194_v50  ;;  %v1475_v27 = vpop.eup %1195 }
 0x284   :  { %vm166_vm6 = vmor %vm164_vm5, %vm165_vm4  ;;  %v407_v31 = vsel %vm149_vm3, %v1475_v27, 0.0 }
 0x285   :  { %v161_v52 = vsub.f32 1.0, %v160_v51 }
 0x287   :  { %v162_v54 = vmul.f32 %v1194_v50, %v161_v52 }
 0x289   :  { %v163_v56 = vadd.f32 %v1194_v50, %v162_v54 }
 0x28b   :  { %v167_v58 = vsel %vm166_vm6, %v1194_v50, %v163_v56 }
 0x28c   :  { %v172_v59 = vsel %vm169_vm7, %v171_v57, %v167_v58 }
 0x28d   :  { %v173_v60 = vmul.f32 %v1192_v39, %v172_v59 }
 0x28f   :  { %1142 = vmatmul.msk.f32.vlgmr.msra.gmra.mxu3 %vm149_vm3, %v173_v60 }
 0x290   :  { %1153 = vmatpush.xpose.msk.msra.mxu3 %vm122_vm1, %v1413_v22 }
 0x293   :  { %v624_v61 = vpop.permute.xlu1 %623 }
 0x297   :  { %1147 = vmatmul.msk.f32.vlgmr.msrb.gmra.mxu3 %vm122_vm1, %v1411_v21 }
 0x298   :  { %1159 = vmatpush.xpose.msk.msrb.mxu3 %vm122_vm1, %v626_v44 }
 0x29b   :  { %v538_v62 = vpop.permute.xlu1 %537 }
 0x29c   :  { %1157 = vmatmul.msk.f32.vlgmr.msra.gmra.mxu0 %vm122_vm1, %v538_v62 }
 0x29f   :  { %1154 = vmatmul.msk.f32.vlgmr.msra.gmra.mxu3 %vm122_vm1, %v1400_v18 }
 0x2a4   :  { %1163 = vmatmul.msk.f32.vlgmr.msrb.gmra.mxu0 %vm122_vm1, %v709_v63 }
 0x2a7   :  { %1160 = vmatmul.msk.f32.vlgmr.msrb.gmra.mxu3 %vm122_vm1, %v624_v61 }
 0x2c6   :  { %v230_v3 = vpop.xlane.xlu1 %229 }
 0x2c7   :  { %v231_v7 = vsub.f32 %v227_v45, %v230_v3 }
 0x2c9   :  { %v232_v15 = vmul.f32 1.442695, %v231_v7  ;;  %v1510_v7 = vadd.f32 %v1443_v41, %v61_v14 }
 0x2cb   :  { %1197 = vpow2.f32 %v232_v15 }
 0x2d1   :  { %v1477_v29 = vpop.eup %1197 }
 0x2d2   :  { %v234_v34 = vsel %vm149_vm3, %v1477_v29, 0.0 }
 0x312   :  { %v194_v0 = vpop.f32.mrf.mxu3 }
 0x313   :  { %197 = vst.msk [vmem:[#allocation2] sm:$0xff] %vm122_vm1, %v194_v0 }
 0x319   :  { %v562_v2 = vpop.f32.mrf.mxu0 }
 0x31a   :  { %v310_v4 = vpop.f32.mrf.mxu3  ;;  %v565_v12 = vmul.f32 0.35355338, %v562_v2 }
 0x31b   :  { %v313_v5 = vmul.f32 0.35355338, %v310_v4 }
 0x31c   :  { %v566_v21 = vsel %vm459_vm8, -1e+09, %v565_v12 }
 0x31d   :  { %v314_v8 = vsel %vm118_vm2, -1e+09, %v313_v5  ;;  %v567_v26 = vsel %vm149_vm3, %v566_v21, -inf }
 0x31e   :  { %v315_v11 = vsel %vm149_vm3, %v314_v8, -inf }
 0x31f   :  { %316 = vmax.xlane.f32.xlu2 %v315_v11 }
 0x321   :  { %v733_v17 = vpop.f32.mrf.mxu0 }
 0x322   :  { %v736_v18 = vmul.f32 0.35355338, %v733_v17  ;;  %v484_v19 = vpop.f32.mrf.mxu3 }
 0x323   :  { %v487_v20 = vmul.f32 0.35355338, %v484_v19 }
 0x324   :  { %v737_v22 = vsel %vm459_vm8, -1e+09, %v736_v18 }
 0x325   :  { %v738_v23 = vsel %vm149_vm3, %v737_v22, -inf  ;;  %v488_v24 = vsel %vm459_vm8, -1e+09, %v487_v20 }
 0x326   :  { %739 = vmax.xlane.f32.xlu0 %v738_v23  ;;  %v489_v25 = vsel %vm149_vm3, %v488_v24, -inf }
 0x327   :  { %490 = vmax.xlane.f32.xlu1 %v489_v25  ;;  %568 = vmax.xlane.f32.xlu2 %v567_v26 }
 0x32a   :  { %v648_v28 = vpop.f32.mrf.mxu3 }
 0x32b   :  { %v651_v30 = vmul.f32 0.35355338, %v648_v28 }
 0x32d   :  { %v652_v32 = vsel %vm459_vm8, -1e+09, %v651_v30 }
 0x32e   :  { %408 = vadd.xlane.f32.xlu0 %v407_v31  ;;  %v653_v33 = vsel %vm149_vm3, %v652_v32, -inf }
 0x32f   :  { %654 = vmax.xlane.f32.xlu1 %v653_v33  ;;  %235 = vadd.xlane.f32.xlu2 %v234_v34 }
 0x348   :  { %253 = vrot.lane.b32.xlu1 %v1394_v16, %s1266_s3 }
 0x392   :  { %v317_v35 = vpop.xlane.xlu2 %316 }
 0x393   :  { %v318_v36 = vsub.f32 %v314_v8, %v317_v35 }
 0x395   :  { %v319_v37 = vmul.f32 1.442695, %v318_v36 }
 0x397   :  { %1199 = vpow2.f32 %v319_v37 }
 0x399   :  { %v740_v38 = vpop.xlane.xlu0 %739 }
 0x39a   :  { %v741_v39 = vsub.f32 %v737_v22, %v740_v38  ;;  %v569_v40 = vpop.xlane.xlu2 %568  ;;  %v491_v42 = vpop.xlane.xlu1 %490 }
 0x39b   :  { %v570_v43 = vsub.f32 %v566_v21, %v569_v40  ;;  %v492_v45 = vsub.f32 %v488_v24, %v491_v42 }
 0x39c   :  { %v742_v44 = vmul.f32 1.442695, %v741_v39 }
 0x39d   :  { %v1487_v46 = vpop.eup %1199  ;;  %v571_v47 = vmul.f32 1.442695, %v570_v43  ;;  %v493_v49 = vmul.f32 1.442695, %v492_v45 }
 0x39e   :  { %1201 = vpow2.f32 %v742_v44  ;;  %v321_v48 = vsel %vm149_vm3, %v1487_v46, 0.0 }
 0x39f   :  { %1203 = vpow2.f32 %v571_v47  ;;  %322 = vadd.xlane.f32.xlu1 %v321_v48 }
 0x3a1   :  { %v409_v10 = vpop.xlane.xlu0 %408 }
 0x3a2   :  { %v236_v50 = vpop.xlane.xlu2 %235  ;;  %v655_v51 = vpop.xlane.xlu1 %654  ;;  %v421_v30 = vand.u32 2147483648, %v409_v10  ;;  %vm415_vm4 = vweird.f32 %v409_v10 }
 0x3a3   :  { %1205 = vrcp.f32 %v236_v50  ;;  %v656_v53 = vsub.f32 %v652_v32, %v655_v51  ;;  %v248_v1 = vand.u32 2147483648, %v236_v50  ;;  %vm242_vm10 = vweird.f32 %v236_v50 }
 0x3a4   :  { %v1491_v52 = vpop.eup %1201  ;;  %1207 = vpow2.f32 %v493_v49  ;;  %v246_v3 = vand.u32 2147483647, %v236_v50  ;;  %v419_v32 = vand.u32 2147483647, %v409_v10  ;;  %v422_v40 = vor.u32 1.1754944e-38, %v421_v30 }
 0x3a5   :  { %v1493_v54 = vpop.eup %1203  ;;  %v744_v55 = vsel %vm149_vm3, %v1491_v52, 0.0  ;;  %v657_v57 = vmul.f32 1.442695, %v656_v53  ;;  %v249_v5 = vor.u32 1.1754944e-38, %v248_v1 }
 0x3a6   :  { %745 = vadd.xlane.f32.xlu2 %v744_v55  ;;  %v573_v56 = vsel %vm149_vm3, %v1493_v54, 0.0  ;;  %vm247_vm12 = vcmp.eq.f32.partialorder %v246_v3, 8.507059e+37  ;;  %vm420_vm7 = vcmp.eq.f32.partialorder %v419_v32, 8.507059e+37 }
 0x3a7   :  { %574 = vadd.xlane.f32.xlu0 %v573_v56  ;;  %1209 = vpow2.f32 %v657_v57 }
 0x3a8   :  { %1211 = vrcp.f32 %v409_v10 }
 0x3a9   :  { %v1206_v58 = vpop.eup %1205 }
 0x3aa   :  { %v1499_v59 = vpop.eup %1207  ;;  %v238_v60 = vmul.f32 %v1206_v58, %v236_v50  ;;  %vm243_vm9 = vweird.f32 %v1206_v58 }
 0x3ab   :  { %v495_v62 = vsel %vm149_vm3, %v1499_v59, 0.0  ;;  %vm244_vm11 = vmor %vm242_vm10, %vm243_vm9 }
 0x3ac   :  { %v239_v61 = vsub.f32 1.0, %v238_v60 }
 0x3ad   :  { %v1503_v2 = vpop.eup %1209 }
 0x3ae   :  { %v240_v63 = vmul.f32 %v1206_v58, %v239_v61  ;;  %496 = vadd.xlane.f32.xlu2 %v495_v62  ;;  %v659_v6 = vsel %vm149_vm3, %v1503_v2, 0.0  ;;  %v1212_v41 = vpop.eup %1211 }
 0x3af   :  { %v411_v13 = vmul.f32 %v1212_v41, %v409_v10  ;;  %vm416_vm14 = vweird.f32 %v1212_v41 }
 0x3b0   :  { %v241_v0 = vadd.f32 %v1206_v58, %v240_v63  ;;  %vm417_vm5 = vmor %vm415_vm4, %vm416_vm14 }
 0x3b1   :  { %v412_v20 = vsub.f32 1.0, %v411_v13 }
 0x3b2   :  { %v245_v4 = vsel %vm244_vm11, %v1206_v58, %v241_v0 }
 0x3b3   :  { %v250_v8 = vsel %vm247_vm12, %v249_v5, %v245_v4 }
 0x3b4   :  { %v251_v11 = vmul.f32 %v1477_v29, %v250_v8 }
 0x3b6   :  { %660 = vadd.xlane.f32.xlu2 %v659_v6 }
 0x3b8   :  { %592 = vrot.lane.b32.xlu1 %v1510_v7, %s1266_s3 }
 0x3ba   :  { %v254_v9 = vpop.permute.xlu1 %253 }
 0x3bb   :  { %274 = vmatpush.msrb.mxu2 %v254_v9  ;;  %339 = vrot.lane.b32.xlu0 %v1394_v16, %s1268_s21 }
 0x3bc   :  { %1145 = vmatmul.msk.f32.vlgmr.msrb.gmra.mxu2 %vm149_vm3, %v251_v11 }
 0x3c0   :  { %762 = vrot.lane.b32.xlu1 %v1510_v7, %s1267_s20 }
 0x3c3   :  { %677 = vrot.lane.b32.xlu0 %v1510_v7, %s1268_s21 }
 0x3ce   :  { %425 = vrot.lane.b32.xlu2 %v1394_v16, %s1267_s20  ;;  %v413_v16 = vmul.f32 %v1212_v41, %v412_v20 }
 0x3d0   :  { %v414_v28 = vadd.f32 %v1212_v41, %v413_v16 }
 0x3d2   :  { %v418_v37 = vsel %vm417_vm5, %v1212_v41, %v414_v28 }
 0x3d3   :  { %v423_v48 = vsel %vm420_vm7, %v422_v40, %v418_v37  ;;  %v798_v37 = vld [vmem:[%s1696_s4 + $0x18] sm:$0xff]  ;;  %v795_v40 = vld [vmem:[%s1696_s4] sm:$0xff] }
 0x412   :  { %v323_v14 = vpop.xlane.xlu1 %322 }
 0x413   :  { %1213 = vrcp.f32 %v323_v14  ;;  %v335_v26 = vand.u32 2147483648, %v323_v14  ;;  %vm329_vm15 = vweird.f32 %v323_v14  ;;  %v333_v29 = vand.u32 2147483647, %v323_v14 }
 0x415   :  { %v336_v36 = vor.u32 1.1754944e-38, %v335_v26  ;;  %vm334_vm6 = vcmp.eq.f32.partialorder %v333_v29, 8.507059e+37 }
 0x419   :  { %v1214_v12 = vpop.eup %1213  ;;  %v1524_v15 = vpop.xlane.xlu2 %745 }
 0x41a   :  { %v325_v17 = vmul.f32 %v1214_v12, %v323_v14  ;;  %v1526_v18 = vpop.xlane.xlu0 %574  ;;  %vm330_vm13 = vweird.f32 %v1214_v12 }
 0x41b   :  { %1215 = vrcp.f32 %v1526_v18  ;;  %vm331_vm2 = vmor %vm329_vm15, %vm330_vm13  ;;  %v585_v61 = vand.u32 2147483647, %v1526_v18  ;;  %v587_v62 = vand.u32 2147483648, %v1526_v18  ;;  %vm581_vm12 = vweird.f32 %v1526_v18 }
 0x41c   :  { %v326_v19 = vsub.f32 1.0, %v325_v17  ;;  %1217 = vrcp.f32 %v1524_v15 }
 0x41d   :  { %vm586_vm15 = vcmp.eq.f32.partialorder %v585_v61, 8.507059e+37  ;;  %v588_v9 = vor.u32 1.1754944e-38, %v587_v62 }
 0x41e   :  { %v327_v21 = vmul.f32 %v1214_v12, %v326_v19  ;;  %v758_v19 = vand.u32 2147483648, %v1524_v15 }
 0x420   :  { %v328_v24 = vadd.f32 %v1214_v12, %v327_v21  ;;  %v756_v21 = vand.u32 2147483647, %v1524_v15 }
 0x421   :  { %v1529_v22 = vpop.eup %1215  ;;  %v497_v23 = vpop.xlane.xlu2 %496 }
 0x422   :  { %1219 = vrcp.f32 %v497_v23  ;;  %v577_v25 = vmul.f32 %v1529_v22, %v1526_v18  ;;  %v1534_v31 = vpop.eup %1217  ;;  %v332_v33 = vsel %vm331_vm2, %v1214_v12, %v328_v24  ;;  %v509_v49 = vand.u32 2147483648, %v497_v23 }
 0x423   :  { %v337_v42 = vsel %vm334_vm6, %v336_v36, %v332_v33  ;;  %v748_v44 = vmul.f32 %v1534_v31, %v1524_v15  ;;  %v507_v51 = vand.u32 2147483647, %v497_v23  ;;  %vm582_vm9 = vweird.f32 %v1529_v22  ;;  %v802_v33 = vld [vmem:[%s1696_s4 + $0x38] sm:$0xff]  ;;  %v799_v36 = vld [vmem:[%s1696_s4 + $0x20] sm:$0xff] }
 0x424   :  { %v578_v34 = vsub.f32 1.0, %v577_v25  ;;  %v338_v55 = vmul.f32 %v1487_v46, %v337_v42  ;;  %vm503_vm10 = vweird.f32 %v497_v23  ;;  %v510_v63 = vor.u32 1.1754944e-38, %v509_v49  ;;  %vm1554_vm14 = vmor %vm581_vm12, %vm582_vm9  ;;  %822 = vmatpush.msra.mxu3 %v802_v33 }
 0x425   :  { %v749_v56 = vsub.f32 1.0, %v748_v44  ;;  %v424_v46 = vmul.f32 %v1475_v27, %v423_v48  ;;  %vm508_vm13 = vcmp.eq.f32.partialorder %v507_v51, 8.507059e+37  ;;  %vm753_vm4 = vweird.f32 %v1534_v31 }
 0x426   :  { %v579_v45 = vmul.f32 %v1529_v22, %v578_v34  ;;  %vm752_vm6 = vweird.f32 %v1524_v15  ;;  %v759_v24 = vor.u32 1.1754944e-38, %v758_v19  ;;  %v801_v34 = vld [vmem:[%s1696_s4 + $0x30] sm:$0xff]  ;;  %vm455_vm12 = vcmask 523648  }
 0x427   :  { %vm754_vm9 = vmor %vm752_vm6, %vm753_vm4  ;;  %823 = vmatpush.msra.mxu3 %v801_v34 }
 0x428   :  { %v1220_v35 = vpop.eup %1219  ;;  %v580_v57 = vadd.f32 %v1529_v22, %v579_v45 }
 0x429   :  { %v499_v38 = vmul.f32 %v1220_v35, %v497_v23  ;;  %v1536_v39 = vpop.xlane.xlu2 %660  ;;  %vm504_vm8 = vweird.f32 %v1220_v35 }
 0x42a   :  { %1221 = vrcp.f32 %v1536_v39  ;;  %v593_v43 = vpop.permute.xlu1 %592  ;;  %vm505_vm11 = vmor %vm503_vm10, %vm504_vm8  ;;  %v584_v27 = vsel %vm1554_vm14, %v1529_v22, %v580_v57  ;;  %v673_v11 = vand.u32 2147483648, %v1536_v39  ;;  %v671_v14 = vand.u32 2147483647, %v1536_v39 }
 0x42b   :  { %v500_v47 = vsub.f32 1.0, %v499_v38  ;;  %v589_v13 = vsel %vm586_vm15, %v588_v9, %v584_v27  ;;  %vm667_vm5 = vweird.f32 %v1536_v39  ;;  %vm757_vm10 = vcmp.eq.f32.partialorder %v756_v21, 8.507059e+37  ;;  %v797_v38 = vld [vmem:[%s1696_s4 + $0x10] sm:$0xff] }
 0x42c   :  { %v674_v20 = vor.u32 1.1754944e-38, %v673_v11  ;;  %vm672_vm8 = vcmp.eq.f32.partialorder %v671_v14, 8.507059e+37  ;;  %v590_v22 = vmul.f32 %v1493_v54, %v589_v13  ;;  %v903_v14 = vld [vmem:[%s1700_s8 + $0x18] sm:$0xff]  ;;  %v900_v13 = vld [vmem:[%s1700_s8] sm:$0xff] }
 0x42d   :  { %v501_v50 = vmul.f32 %v1220_v35, %v500_v47  ;;  %v340_v53 = vpop.permute.xlu0 %339 }
 0x42e   :  { %360 = vmatpush.msra.mxu2 %v340_v53 }
 0x42f   :  { %v502_v58 = vadd.f32 %v1220_v35, %v501_v50  ;;  %1148 = vmatmul.msk.f32.vlgmr.msra.gmra.mxu2 %vm149_vm3, %v338_v55  ;;  %v1184_v50 = vld [vmem:[%s1697_s5] ss:$0 sm:$0xff]  ;;  %s1273_s5 = smov 8  }
 0x430   :  { %v1222_v60 = vpop.eup %1221  ;;  %531 = vmatpush.msrb.mxu2 %v1510_v7  ;;  %v750_v7 = vmul.f32 %v1534_v31, %v749_v56 }
 0x431   :  { %v506_v0 = vsel %vm505_vm11, %v1220_v35, %v502_v58  ;;  %v663_v1 = vmul.f32 %v1222_v60, %v1536_v39  ;;  %v426_v3 = vpop.permute.xlu2 %425  ;;  %vm668_vm2 = vweird.f32 %v1222_v60  ;;  %vm283_vm11 = vcmask 261248   ;;  %v800_v35 = vld [vmem:[%s1696_s4 + $0x28] sm:$0xff] }
 0x432   :  { %v511_v5 = vsel %vm508_vm13, %v510_v63, %v506_v0  ;;  %v763_v6 = vpop.permute.xlu1 %762  ;;  %446 = vmatpush.msra.mxu1 %v426_v3  ;;  %v751_v17 = vadd.f32 %v1534_v31, %v750_v7  ;;  %vm669_vm7 = vmor %vm667_vm5, %vm668_vm2  ;;  %824 = vmatpush.msra.mxu3 %v800_v35  ;;  %v796_v39 = vld [vmem:[%s1696_s4 + $0x8] sm:$0xff]  ;;  %vm807_vm13 = vcmask 523264  }
 0x433   :  { %v664_v8 = vsub.f32 1.0, %v663_v1  ;;  %1151 = vmatmul.msk.f32.vlgmr.msra.gmra.mxu1 %vm149_vm3, %v424_v46  ;;  %v512_v12 = vmul.f32 %v1499_v59, %v511_v5 }
 0x434   :  { %613 = vmatpush.msrb.mxu1 %v593_v43  ;;  %v755_v23 = vsel %vm754_vm9, %v1534_v31, %v751_v17  ;;  %825 = vmatpush.msra.mxu3 %v799_v36 }
 0x435   :  { %v665_v10 = vmul.f32 %v1222_v60, %v664_v8  ;;  %v678_v41 = vpop.permute.xlu0 %677  ;;  %v760_v26 = vsel %vm757_vm10, %v759_v24, %v755_v23 }
 0x436   :  { %783 = vmatpush.msra.mxu1 %v763_v6  ;;  %698 = vmatpush.msra.mxu2 %v678_v41  ;;  %v761_v15 = vmul.f32 %v1491_v52, %v760_v26  ;;  %v902_v41 = vld [vmem:[%s1700_s8 + $0x10] sm:$0xff] }
 0x437   :  { %v666_v18 = vadd.f32 %v1222_v60, %v665_v10  ;;  %1155 = vmatmul.msk.f32.vlgmr.msrb.gmra.mxu2 %vm149_vm3, %v512_v12  ;;  %826 = vmatpush.msra.mxu3 %v798_v37  ;;  %v901_v12 = vld [vmem:[%s1700_s8 + $0x8] sm:$0xff] }
 0x438   :  { %926 = vmatpush.msrb.mxu2 %v903_v14 }
 0x439   :  { %v670_v59 = vsel %vm669_vm7, %v1222_v60, %v666_v18  ;;  %827 = vmatpush.msra.mxu3 %v797_v38  ;;  %v1270_v60 = vmov 32.0  }
 0x43a   :  { %v675_v16 = vsel %vm672_vm8, %v674_v20, %v670_v59  ;;  %1223 = vrcp.f32 %v1270_v60  ;;  %927 = vmatpush.msrb.mxu2 %v902_v41 }
 0x43b   :  { %1158 = vmatmul.msk.f32.vlgmr.msrb.gmra.mxu1 %vm149_vm3, %v590_v22  ;;  %v676_v25 = vmul.f32 %v1503_v2, %v675_v16  ;;  %828 = vmatpush.msra.mxu3 %v796_v39 }
 0x43c   :  { %928 = vmatpush.msrb.mxu2 %v901_v12 }
 0x43d   :  { %829 = vmatpush.msra.mxu3 %v795_v40  ;;  %v1187_v40 = vld [vmem:[%s1701_s9] ss:$0 sm:$0xff] }
 0x43e   :  { %929 = vmatpush.msrb.mxu2 %v900_v13 }
 0x43f   :  { %v276_v28 = vpop.f32.mrf.mxu2  ;;  %1161 = vmatmul.msk.f32.vlgmr.msra.gmra.mxu2 %vm149_vm3, %v676_v25 }
 0x440   :  { %280 = vrot.lane.b32.xlu0 %v276_v28, %s1269_s22  ;;  %v1224_v61 = vpop.eup %1223  ;;  %v1185_v28 = vld [vmem:[%s1698_s6] ss:$0 sm:$0xff] }
 0x441   :  { %v846_v62 = vmul.f32 32.0, %v1224_v61  ;;  %vm850_vm14 = vweird.f32 %v1224_v61 }
 0x443   :  { %1164 = vmatmul.msk.f32.vlgmr.msra.gmra.mxu1 %vm149_vm3, %v761_v15  ;;  %vm369_vm3 = vcmask 392448   ;;  %v847_v63 = vsub.f32 1.0, %v846_v62 }
 0x445   :  { %v848_v46 = vmul.f32 %v1224_v61, %v847_v63 }
 0x447   :  { %v849_v0 = vadd.f32 %v1224_v61, %v848_v46 }
 0x449   :  { %v1618_v1 = vsel %vm850_vm14, %v1224_v61, %v849_v0  ;;  %v1026_v0 = vld [vmem:[%s1702_s10 + $0x8] sm:$0xff] }
 0x44a   :  { %1051 = vmatpush.msra.mxu0 %v1026_v0 }
 0x4b0   :  { %v448_v54 = vpop.f32.mrf.mxu1 }
 0x4b1   :  { %452 = vrot.lane.b32.xlu2 %v448_v54, %s1264_s19 }
 0x4b2   :  { %v362_v29 = vpop.f32.mrf.mxu2  ;;  %v281_v30 = vpop.permute.xlu0 %280 }
 0x4b3   :  { %284 = vst.msk [vmem:[#allocation2] sm:$0xff] %vm283_vm11, %v281_v30  ;;  %366 = vrot.lane.b32.xlu1 %v362_v29, %s1263_s2  ;;  %v1186_v29 = vld [vmem:[%s1699_s7] ss:$0 sm:$0xff] }
 0x4b8   :  { %v615_v2 = vpop.f32.mrf.mxu1 }
 0x4b9   :  { %619 = vrot.lane.b32.xlu0 %v615_v2, %s1269_s22 }
 0x4ba   :  { %v533_v31 = vpop.f32.mrf.mxu2 }
 0x4bb   :  { %536 = vst.msk [vmem:[#allocation2 + $0x8] sm:$0xff] %vm122_vm1, %v533_v31 }
 0x4c0   :  { %v785_v32 = vpop.f32.mrf.mxu1 }
 0x4c1   :  { %789 = vrot.lane.b32.xlu2 %v785_v32, %s1264_s19 }
 0x4c2   :  { %v700_v52 = vpop.f32.mrf.mxu2 }
 0x4c3   :  { %704 = vrot.lane.b32.xlu1 %v700_v52, %s1263_s2 }
 0x50b   :  { %v453_v43 = vpop.permute.xlu2 %452 }
 0x51b   :  { %v790_v48 = vpop.permute.xlu2 %789 }
 0x525   :  { %v367_v42 = vpop.permute.xlu1 %366 }
 0x526   :  { %370 = vst.msk [vmem:[#allocation2] sm:$0xff] %vm369_vm3, %v367_v42 }
 0x527   :  { %456 = vst.msk [vmem:[#allocation2] sm:$0xff] %vm455_vm12, %v453_v43 }
 0x52b   :  { %v620_v44 = vpop.permute.xlu0 %619 }
 0x52c   :  { %622 = vst.msk [vmem:[#allocation2 + $0x8] sm:$0xff] %vm283_vm11, %v620_v44 }
 0x52e   :  { %v793_v45 = vld [vmem:[#allocation2] sm:$0xff] }
 0x52f   :  { %1165 = vmatmul.msk.f32.vlgmr.msra.gmra.mxu3 %vm807_vm13, %v793_v45 }
 0x535   :  { %v705_v47 = vpop.permute.xlu1 %704 }
 0x536   :  { %707 = vst.msk [vmem:[#allocation2 + $0x8] sm:$0xff] %vm369_vm3, %v705_v47 }
 0x537   :  { %792 = vst.msk [vmem:[#allocation2 + $0x8] sm:$0xff] %vm455_vm12, %v790_v48 }
 0x53e   :  { %v794_v49 = vld [vmem:[#allocation2 + $0x8] sm:$0xff] }
 0x53f   :  { %1166 = vmatmul.msk.f32.gmra.mxu3 %vm807_vm13, %v794_v49 }
 0x5b2   :  { %v831_v51 = vpop.f32.mrf.mxu3 }
 0x5b3   :  { %v832_v53 = vadd.f32 %v1184_v50, %v831_v51 }
 0x5b5   :  { %v839_v55 = vsel %vm64_vm0, %v832_v53, 0.0 }
 0x5b6   :  { %840 = vadd.xlane.f32.xlu0 %v839_v55 }
 0x5c2   :  { %v834_v56 = vpop.f32.mrf.mxu3 }
 0x5c3   :  { %v835_v57 = vadd.f32 %v1184_v50, %v834_v56 }
 0x5c5   :  { %v842_v58 = vsel %vm64_vm0, %v835_v57, 0.0 }
 0x5c6   :  { %843 = vadd.xlane.f32.xlu1 %v842_v58 }
 0x629   :  { %v841_v3 = vpop.xlane.xlu0 %840 }
 0x62a   :  { %v852_v4 = vmul.f32 %v1618_v1, %v841_v3 }
 0x62c   :  { %v854_v5 = vsub.f32 %v832_v53, %v852_v4 }
 0x62e   :  { %v856_v6 = vmul.f32 %v854_v5, %v854_v5 }
 0x630   :  { %v858_v7 = vsel %vm64_vm0, %v856_v6, 0.0 }
 0x631   :  { %859 = vadd.xlane.f32.xlu2 %v858_v7 }
 0x639   :  { %v844_v27 = vpop.xlane.xlu1 %843 }
 0x63a   :  { %v853_v8 = vmul.f32 %v1618_v1, %v844_v27 }
 0x63c   :  { %v855_v9 = vsub.f32 %v835_v57, %v853_v8 }
 0x63e   :  { %v857_v11 = vmul.f32 %v855_v9, %v855_v9 }
 0x640   :  { %v861_v10 = vsel %vm64_vm0, %v857_v11, 0.0 }
 0x641   :  { %862 = vadd.xlane.f32.xlu0 %v861_v10 }
 0x6a4   :  { %v860_v17 = vpop.xlane.xlu2 %859 }
 0x6a5   :  { %v864_v18 = vmul.f32 %v860_v17, %v1618_v1 }
 0x6a7   :  { %v866_v19 = vadd.f32 1e-05, %v864_v18 }
 0x6a9   :  { %1225 = vrsqrt.f32 %v866_v19  ;;  %vm874_vm2 = vweird.f32 %v866_v19 }
 0x6af   :  { %v1226_v20 = vpop.eup %1225 }
 0x6b0   :  { %v869_v21 = vmul.f32 %v1226_v20, %v866_v19  ;;  %vm875_vm15 = vweird.f32 %v1226_v20 }
 0x6b1   :  { %vm876_vm4 = vmor %vm874_vm2, %vm875_vm15 }
 0x6b2   :  { %v870_v59 = vmul.f32 %v1226_v20, %v869_v21 }
 0x6b4   :  { %v871_v22 = vmul.f32 0.5, %v870_v59  ;;  %v863_v16 = vpop.xlane.xlu0 %862 }
 0x6b5   :  { %v865_v23 = vmul.f32 %v863_v16, %v1618_v1 }
 0x6b6   :  { %v872_v24 = vsub.f32 1.5, %v871_v22 }
 0x6b7   :  { %v867_v25 = vadd.f32 1e-05, %v865_v23 }
 0x6b8   :  { %v873_v26 = vmul.f32 %v1226_v20, %v872_v24 }
 0x6b9   :  { %1227 = vrsqrt.f32 %v867_v25  ;;  %vm884_vm6 = vweird.f32 %v867_v25 }
 0x6ba   :  { %v877_v15 = vsel %vm876_vm4, %v1226_v20, %v873_v26 }
 0x6bb   :  { %v888_v54 = vmul.f32 %v877_v15, %v854_v5  ;;  %v1025_v5 = vld [vmem:[%s1702_s10] sm:$0xff] }
 0x6bc   :  { %1052 = vmatpush.msra.mxu0 %v1025_v5 }
 0x6bd   :  { %v893_v30 = vmul.f32 %v1185_v28, %v888_v54 }
 0x6bf   :  { %v1228_v2 = vpop.eup %1227  ;;  %v898_v31 = vadd.f32 %v1186_v29, %v893_v30 }
 0x6c0   :  { %v879_v32 = vmul.f32 %v1228_v2, %v867_v25  ;;  %vm885_vm5 = vweird.f32 %v1228_v2 }
 0x6c1   :  { %1167 = vmatmul.msk.f32.vlgmr.msrb.gmra.mxu2 %vm64_vm0, %v898_v31  ;;  %vm886_vm7 = vmor %vm884_vm6, %vm885_vm5 }
 0x6c2   :  { %v880_v52 = vmul.f32 %v1228_v2, %v879_v32 }
 0x6c4   :  { %v881_v33 = vmul.f32 0.5, %v880_v52 }
 0x6c6   :  { %v882_v34 = vsub.f32 1.5, %v881_v33 }
 0x6c8   :  { %v883_v35 = vmul.f32 %v1228_v2, %v882_v34 }
 0x6ca   :  { %v887_v36 = vsel %vm886_vm7, %v1228_v2, %v883_v35 }
 0x6cb   :  { %v889_v37 = vmul.f32 %v887_v36, %v855_v9 }
 0x6cd   :  { %v894_v38 = vmul.f32 %v1185_v28, %v889_v37 }
 0x6cf   :  { %v899_v39 = vadd.f32 %v1186_v29, %v894_v38 }
 0x6d1   :  { %1168 = vmatmul.msk.f32.gmra.mxu2 %vm64_vm0, %v899_v39 }
 0x744   :  { %v931_v42 = vpop.f32.mrf.mxu2 }
 0x745   :  { %v1649_v43 = vadd.f32 %v1187_v40, %v931_v42 }
 0x747   :  { %v939_v44 = vmul.f32 0.70710677, %v1649_v43  ;;  %v937_v42 = vmul.f32 0.5, %v1649_v43 }
 0x749   :  { %v941_v45 = vmul.f32 %v939_v44, %v939_v44 }
 0x74b   :  { %v942_v47 = vmin.f32 %v941_v45, 16.0 }
 0x74d   :  { %v943_v48 = vmul.f32 2.1237322e-06, %v942_v47  ;;  %v954_v49 = vmul.f32 3.8918573e-05, %v942_v47 }
 0x74f   :  { %v944_v50 = vadd.f32 0.00028619796, %v943_v48  ;;  %v955_v51 = vadd.f32 0.001143296, %v954_v49 }
 0x751   :  { %v945_v53 = vmul.f32 %v944_v50, %v942_v47  ;;  %v956_v55 = vmul.f32 %v955_v51, %v942_v47 }
 0x753   :  { %v946_v56 = vadd.f32 0.0036580483, %v945_v53  ;;  %v957_v57 = vadd.f32 0.014752088, %v956_v55 }
 0x754   :  { %v934_v58 = vpop.f32.mrf.mxu2 }
 0x755   :  { %v958_v60 = vmul.f32 %v957_v57, %v942_v47  ;;  %v1652_v61 = vadd.f32 %v1187_v40, %v934_v58  ;;  %v947_v62 = vmul.f32 %v946_v56, %v942_v47 }
 0x757   :  { %v959_v63 = vadd.f32 0.112945676, %v958_v60  ;;  %v1655_v46 = vmul.f32 0.70710677, %v1652_v61  ;;  %v948_v6 = vadd.f32 0.05243302, %v947_v62 }
 0x759   :  { %v960_v3 = vmul.f32 %v959_v63, %v942_v47  ;;  %v981_v4 = vmul.f32 %v1655_v46, %v1655_v46  ;;  %v949_v10 = vmul.f32 %v948_v6, %v942_v47  ;;  %v1188_v6 = vld [vmem:[%s1703_s11] ss:$0 sm:$0xff] }
 0x75b   :  { %v961_v7 = vadd.f32 0.4994258, %v960_v3  ;;  %v982_v27 = vmin.f32 %v981_v4, 16.0  ;;  %v950_v18 = vadd.f32 0.18741608, %v949_v10  ;;  %v938_v3 = vmul.f32 0.5, %v1652_v61 }
 0x75d   :  { %v962_v8 = vmul.f32 %v961_v7, %v942_v47  ;;  %v983_v9 = vmul.f32 2.1237322e-06, %v982_v27  ;;  %v994_v11 = vmul.f32 3.8918573e-05, %v982_v27  ;;  %v951_v22 = vmul.f32 %v950_v18, %v942_v47 }
 0x75f   :  { %v963_v14 = vadd.f32 1.0, %v962_v8  ;;  %v984_v41 = vadd.f32 0.00028619796, %v983_v9  ;;  %v995_v12 = vadd.f32 0.001143296, %v994_v11 }
 0x760   :  { %v952_v28 = vadd.f32 1.1283791, %v951_v22 }
 0x761   :  { %1229 = vrcp.f32 %v963_v14  ;;  %v985_v13 = vmul.f32 %v984_v41, %v982_v27  ;;  %v996_v17 = vmul.f32 %v995_v12, %v982_v27  ;;  %v975_v15 = vand.u32 2147483648, %v963_v14 }
 0x762   :  { %v973_v29 = vand.u32 2147483647, %v963_v14  ;;  %vm969_vm9 = vweird.f32 %v963_v14  ;;  %v953_v33 = vmul.f32 %v952_v28, %v939_v44 }
 0x763   :  { %v997_v19 = vadd.f32 0.014752088, %v996_v17  ;;  %v986_v20 = vadd.f32 0.0036580483, %v985_v13  ;;  %v976_v52 = vor.u32 1.1754944e-38, %v975_v15 }
 0x764   :  { %vm974_vm11 = vcmp.eq.f32.partialorder %v973_v29, 8.507059e+37 }
 0x765   :  { %v998_v21 = vmul.f32 %v997_v19, %v982_v27  ;;  %v987_v24 = vmul.f32 %v986_v20, %v982_v27 }
 0x767   :  { %v1230_v59 = vpop.eup %1229  ;;  %v999_v23 = vadd.f32 0.112945676, %v998_v21  ;;  %v988_v2 = vadd.f32 0.05243302, %v987_v24 }
 0x768   :  { %v965_v16 = vmul.f32 %v1230_v59, %v963_v14  ;;  %vm970_vm8 = vweird.f32 %v1230_v59 }
 0x769   :  { %v1000_v26 = vmul.f32 %v999_v23, %v982_v27  ;;  %vm971_vm10 = vmor %vm969_vm9, %vm970_vm8  ;;  %v989_v37 = vmul.f32 %v988_v2, %v982_v27 }
 0x76a   :  { %v966_v25 = vsub.f32 1.0, %v965_v16 }
 0x76b   :  { %v1001_v30 = vadd.f32 0.4994258, %v1000_v26  ;;  %v990_v40 = vadd.f32 0.18741608, %v989_v37 }
 0x76c   :  { %v967_v54 = vmul.f32 %v1230_v59, %v966_v25 }
 0x76d   :  { %v1002_v32 = vmul.f32 %v1001_v30, %v982_v27  ;;  %v991_v49 = vmul.f32 %v990_v40, %v982_v27  ;;  %v1189_v30 = vld [vmem:[%s1704_s12] ss:$0 sm:$0xff]  ;;  %s1271_s12 = smov [#allocation3]  }
 0x76e   :  { %v968_v31 = vadd.f32 %v1230_v59, %v967_v54  ;;  %s1122_s21 = sshll.u32 %s1271_s12, 4  ;;  %s1123_s21 = int_to_ptr.vmem [resolvable:$true] %s1122_s21 }
 0x76f   :  { %v1003_v35 = vadd.f32 1.0, %v1002_v32  ;;  %v992_v53 = vadd.f32 1.1283791, %v991_v49  ;;  %v1190_v32 = vld [vmem:[%s1705_s13] ss:$0 sm:$0xff]  ;;  %s1124_s13 = sshll.u32 %s1706_s14, 4  ;;  %s1125_s13 = int_to_ptr.hbm [resolvable:$true] %s1124_s13 }
 0x770   :  { %v972_v34 = vsel %vm971_vm10, %v1230_v59, %v968_v31 }
 0x771   :  { %v977_v36 = vsel %vm974_vm11, %v976_v52, %v972_v34  ;;  %1231 = vrcp.f32 %v1003_v35  ;;  %v1015_v44 = vand.u32 2147483648, %v1003_v35  ;;  %v1013_v56 = vand.u32 2147483647, %v1003_v35 }
 0x772   :  { %v978_v38 = vmul.f32 %v977_v36, %v953_v33  ;;  %vm1009_vm12 = vweird.f32 %v1003_v35  ;;  %v993_v60 = vmul.f32 %v992_v53, %v1655_v46 }
 0x773   :  { %v1016_v58 = vor.u32 1.1754944e-38, %v1015_v44  ;;  %vm1014_vm14 = vcmp.eq.f32.partialorder %v1013_v56, 8.507059e+37 }
 0x774   :  { %v1169_v39 = vclamps-f32 %v978_v38, 1.0 }
 0x776   :  { %v1021_v45 = vadd.f32 1.0, %v1169_v39 }
 0x777   :  { %v1232_v47 = vpop.eup %1231 }
 0x778   :  { %v1023_v48 = vmul.f32 %v1021_v45, %v937_v42  ;;  %v1005_v50 = vmul.f32 %v1232_v47, %v1003_v35  ;;  %vm1010_vm3 = vweird.f32 %v1232_v47 }
 0x779   :  { %vm1011_vm13 = vmor %vm1009_vm12, %vm1010_vm3 }
 0x77a   :  { %1171 = vmatmul.msk.f32.vlgmr.msra.gmra.mxu0 %vm122_vm1, %v1023_v48  ;;  %v1006_v51 = vsub.f32 1.0, %v1005_v50 }
 0x77c   :  { %v1007_v55 = vmul.f32 %v1232_v47, %v1006_v51 }
 0x77e   :  { %v1008_v57 = vadd.f32 %v1232_v47, %v1007_v55 }
 0x780   :  { %v1012_v43 = vsel %vm1011_vm13, %v1232_v47, %v1008_v57 }
 0x781   :  { %v1017_v62 = vsel %vm1014_vm14, %v1016_v58, %v1012_v43 }
 0x782   :  { %v1018_v63 = vmul.f32 %v1017_v62, %v993_v60 }
 0x784   :  { %v1170_v0 = vclamps-f32 %v1018_v63, 1.0 }
 0x786   :  { %v1022_v4 = vadd.f32 1.0, %v1170_v0 }
 0x788   :  { %v1024_v5 = vmul.f32 %v1022_v4, %v938_v3 }
 0x78a   :  { %1172 = vmatmul.msk.f32.gmra.mxu0 %vm122_vm1, %v1024_v5 }
 0x7f7   :  { %v1054_v7 = vpop.f32.mrf.mxu0 }
 0x7f8   :  { %v1055_v27 = vadd.f32 %v1188_v6, %v1054_v7 }
 0x7fa   :  { %v1062_v8 = vsel %vm64_vm0, %v1055_v27, 0.0 }
 0x7fb   :  { %1063 = vadd.xlane.f32.xlu1 %v1062_v8 }
 0x807   :  { %v1057_v46 = vpop.f32.mrf.mxu0 }
 0x808   :  { %v1058_v9 = vadd.f32 %v1188_v6, %v1057_v46 }
 0x80a   :  { %v1065_v11 = vsel %vm64_vm0, %v1058_v9, 0.0 }
 0x80b   :  { %1066 = vadd.xlane.f32.xlu2 %v1065_v11 }
 0x86e   :  { %v1064_v10 = vpop.xlane.xlu1 %1063 }
 0x86f   :  { %v1068_v61 = vmul.f32 %v1064_v10, %v1618_v1 }
 0x871   :  { %v1070_v14 = vsub.f32 %v1055_v27, %v1068_v61 }
 0x873   :  { %v1072_v41 = vmul.f32 %v1070_v14, %v1070_v14 }
 0x875   :  { %v1074_v12 = vsel %vm64_vm0, %v1072_v41, 0.0 }
 0x876   :  { %1075 = vadd.xlane.f32.xlu0 %v1074_v12 }
 0x87e   :  { %v1067_v13 = vpop.xlane.xlu2 %1066 }
 0x87f   :  { %v1069_v17 = vmul.f32 %v1067_v13, %v1618_v1 }
 0x881   :  { %v1071_v18 = vsub.f32 %v1058_v9, %v1069_v17 }
 0x883   :  { %v1073_v19 = vmul.f32 %v1071_v18, %v1071_v18 }
 0x885   :  { %v1077_v20 = vsel %vm64_vm0, %v1073_v19, 0.0 }
 0x886   :  { %1078 = vadd.xlane.f32.xlu1 %v1077_v20 }
 0x8e9   :  { %v1076_v21 = vpop.xlane.xlu0 %1075 }
 0x8ea   :  { %v1080_v59 = vmul.f32 %v1076_v21, %v1618_v1 }
 0x8ec   :  { %v1082_v22 = vadd.f32 1e-05, %v1080_v59 }
 0x8ee   :  { %1233 = vrsqrt.f32 %v1082_v22  ;;  %vm1090_vm15 = vweird.f32 %v1082_v22 }
 0x8f4   :  { %v1234_v16 = vpop.eup %1233 }
 0x8f5   :  { %v1085_v23 = vmul.f32 %v1234_v16, %v1082_v22  ;;  %vm1091_vm1 = vweird.f32 %v1234_v16 }
 0x8f6   :  { %vm1092_vm2 = vmor %vm1090_vm15, %vm1091_vm1 }
 0x8f7   :  { %v1086_v24 = vmul.f32 %v1234_v16, %v1085_v23 }
 0x8f9   :  { %v1087_v25 = vmul.f32 0.5, %v1086_v24  ;;  %v1079_v26 = vpop.xlane.xlu1 %1078 }
 0x8fa   :  { %v1081_v15 = vmul.f32 %v1079_v26, %v1618_v1 }
 0x8fb   :  { %v1088_v28 = vsub.f32 1.5, %v1087_v25 }
 0x8fc   :  { %v1083_v29 = vadd.f32 1e-05, %v1081_v15 }
 0x8fd   :  { %v1089_v54 = vmul.f32 %v1234_v16, %v1088_v28 }
 0x8fe   :  { %1235 = vrsqrt.f32 %v1083_v29  ;;  %vm1100_vm5 = vweird.f32 %v1083_v29 }
 0x8ff   :  { %v1093_v2 = vsel %vm1092_vm2, %v1234_v16, %v1089_v54 }
 0x900   :  { %v1104_v31 = vmul.f32 %v1093_v2, %v1070_v14 }
 0x902   :  { %v1109_v52 = vmul.f32 %v1189_v30, %v1104_v31 }
 0x904   :  { %v1114_v33 = vadd.f32 %v1190_v32, %v1109_v52  ;;  %v1236_v34 = vpop.eup %1235 }
 0x905   :  { %v1095_v35 = vmul.f32 %v1236_v34, %v1083_v29  ;;  %vm1101_vm4 = vweird.f32 %v1236_v34 }
 0x906   :  { %1116 = vst.msk [vmem:[#allocation3] sm:$0xff] %vm64_vm0, %v1114_v33  ;;  %vm1102_vm6 = vmor %vm1100_vm5, %vm1101_vm4 }
 0x907   :  { %v1096_v1 = vmul.f32 %v1236_v34, %v1095_v35 }
 0x909   :  { %v1097_v36 = vmul.f32 0.5, %v1096_v1 }
 0x90b   :  { %v1098_v37 = vsub.f32 1.5, %v1097_v36 }
 0x90d   :  { %v1099_v38 = vmul.f32 %v1236_v34, %v1098_v37 }
 0x90f   :  { %v1103_v39 = vsel %vm1102_vm6, %v1236_v34, %v1099_v38 }
 0x910   :  { %v1105_v40 = vmul.f32 %v1103_v39, %v1071_v18 }
 0x912   :  { %v1110_v42 = vmul.f32 %v1189_v30, %v1105_v40 }
 0x914   :  { %v1115_v45 = vadd.f32 %v1190_v32, %v1110_v42 }
 0x916   :  { %1117 = vst.msk [vmem:[#allocation3 + $0x8] sm:$0xff] %vm64_vm0, %v1115_v45 }
 0x917   :  { %1130 = dma.vmem_to_hbm [thread:$0]  %s1123_s21, 256, %s1125_s13, [#allocation4], %s1272_s23, %s1272_s23, %s1273_s5  }
 0x918   :  { %1261 = dma.done.wait [#allocation4], 256  }
 0x919   :  { %1262 = vsyncadd [#allocation4], 4294967040 }
 0x91a   :  { %1135 = vsyncpa [#allocation4], 1 }

</bundles_post_ra>
